<compile_context>
chip_gen: v5e
topology: v5e:2x2
jax: 0.10.0
libtpu: 0.0.40
codegen_flags: <defaults>
</compile_context>

<pallas_src>
import jax
import jax.numpy as jnp
from jax.experimental import pallas as pl
from jax.experimental.pallas import tpu as pltpu

# ---- small, self-consistent sizes (scaled down from 512 / 64-128-256-512) ----
B = 2                       # batch
L = 16                      # hardcoded repeat(1, 1, 16) in the PyTorch forward
D = 128                     # upstream feature dim
C1, C2, C3, C4 = 16, 32, 64, 128   # conv channels (C4 == D so cat/MLP dims line up)
H1, H2 = 64, 32             # MLP hidden dims (scaled down from 256 / 64)

LANES = 128                 # packing width: the slab is [rows, 128]
OUT1_LANE = 0               # lane of out1 in the fused head output
OUT2_LANE = 64              # lane of out2 in the fused head output

# ---------------------- packed parameter slab layout ---------------------------
# Weight entries: (name, rows, cols used by the kernel).  All row offsets / counts
# are multiples of 16 so the bf16 (16,128) tiling stays aligned.
_W_ENTRIES = (
    ("conv1", D, LANES),            # fused edge/interior/edge taps at lanes 0:48
    ("conv2", 3 * LANES, LANES),    # im2col: tap k at rows k*128, cols 0:C2
    ("conv3", 3 * LANES, LANES),
    ("conv4", 3 * LANES, LANES),
    ("mlp1", C4 + D, 2 * H1),       # cols 0:64 = [omlp1; 0], cols 64:128 = tmlp1
    ("mlp2", 2 * H1, 2 * H2),       # block-diag(omlp2, tmlp2)
    ("mlp3", 2 * H2, LANES),        # omlp3 -> lane 0, tmlp3 -> lane 64
)
_W_LAYOUT = {}
_off = 0
for _n, _rows, _cols in _W_ENTRIES:
    _W_LAYOUT[_n] = (_off, _rows, _cols)
    _off += _rows
W_ROWS = _off                       # 1728

# Bias rows appended below the weights (fused per layer), padded to a full tile.
_B_ENTRIES = (("conv1", LANES), ("conv2", LANES), ("conv3", LANES), ("conv4", LANES),
              ("mlp1", 2 * H1), ("mlp2", 2 * H2), ("mlp3", LANES))
_B_LAYOUT = {n: (i, c) for i, (n, c) in enumerate(_B_ENTRIES)}
B_BLOCK_ROWS = 16
PACK_ROWS = W_ROWS + B_BLOCK_ROWS   # 1744


# ----------------------------- kernel helpers ---------------------------------
def _w(pack_ref, name):
    r0, rows, cols = _W_LAYOUT[name]
    return pack_ref[r0:r0 + rows, 0:cols].astype(jnp.float32)


def _b(bias_blk, name):
    i, cols = _B_LAYOUT[name]
    return bias_blk[i:i + 1, 0:cols]


def _conv_block(x, seq_len, w, b):
    """Conv1d(k=3,s=1,p=1) + ReLU + MaxPool1d(2) on a batch-flattened map.

    x: (B*seq_len, 128) with channels lane-dense (zero past the true Cin).
    Returns (B*seq_len//2, 128).  One im2col MXU matmul per block.
    """
    r = x.shape[0]
    zero_row = jnp.zeros((1, LANES), jnp.float32)
    xm1 = jnp.concatenate([zero_row, x[:r - 1, :]], axis=0)    # x[t-1] (global shift)
    xp1 = jnp.concatenate([x[1:, :], zero_row], axis=0)        # x[t+1]
    pos = jax.lax.broadcasted_iota(jnp.int32, (r, LANES), 0) % seq_len
    xm1 = jnp.where(pos == 0, 0.0, xm1)                # zero pad at each seq start
    xp1 = jnp.where(pos == seq_len - 1, 0.0, xp1)      # zero pad at each seq end
    xi = jnp.concatenate([xm1, x, xp1], axis=1)        # (r, 3*128), 128-aligned
    y = jnp.dot(xi, w, preferred_element_type=jnp.float32) + b
    y = jnp.maximum(y, 0.0)                            # ReLU
    # MaxPool1d(2): rows (2t, 2t+1) never straddle a batch boundary (seq_len even).
    pairs = [jnp.maximum(y[2 * t:2 * t + 1, :], y[2 * t + 1:2 * t + 2, :])
             for t in range(r // 2)]
    return pairs[0] if len(pairs) == 1 else jnp.concatenate(pairs, axis=0)


def crnn10_v2_kernel(emb_ref, pack_ref, out_ref):
    wav = emb_ref[:, 0:D]                      # (B, D)  f32
    txt = emb_ref[:, D:2 * D]                  # (B, D)
    bias = pack_ref[W_ROWS:W_ROWS + 8, :].astype(jnp.float32)   # (8, 128)

    # ---- conv_block1 on wav.unsqueeze(-1).repeat(1,1,16), fused in ONE matmul ----
    # Output lanes 0:16 = left-edge rows (W1+W2), 16:32 = interior (W0+W1+W2),
    # 32:48 = right-edge (W0+W1); lanes 48:128 are exactly 0 after ReLU.
    y = jnp.dot(wav, _w(pack_ref, "conv1"), preferred_element_type=jnp.float32)
    y = jnp.maximum(y + _b(bias, "conv1"), 0.0)                # (B, 128)

    # Bring the interior / right-edge groups to lanes 0:16 with XLU rotations.
    # Rolling both directions and taking the max is direction-convention proof:
    # the "wrong" direction lands on the exactly-zero upper lanes and y >= 0.
    ym = jnp.maximum(pltpu.roll(y, C1, 1), pltpu.roll(y, LANES - C1, 1))
    yr = jnp.maximum(pltpu.roll(y, 2 * C1, 1), pltpu.roll(y, LANES - 2 * C1, 1))
    lane = jax.lax.broadcasted_iota(jnp.int32, (B, LANES), 1)
    keep = lane < C1
    row_first = jnp.where(keep, jnp.maximum(y, ym), 0.0)       # pooled row 0
    row_mid = jnp.where(keep, ym, 0.0)                         # pooled rows 1..6
    row_last = jnp.where(keep, jnp.maximum(ym, yr), 0.0)       # pooled row 7

    # Assemble the pooled conv1 output directly, batch-flattened: (B*8, 128).
    rows = []
    for bi in range(B):
        rows.append(row_first[bi:bi + 1, :])
        rows.append(jnp.broadcast_to(row_mid[bi:bi + 1, :], (L // 2 - 2, LANES)))
        rows.append(row_last[bi:bi + 1, :])
    x = jnp.concatenate(rows, axis=0)                          # (16, 128)

    x = _conv_block(x, 8, _w(pack_ref, "conv2"), _b(bias, "conv2"))   # (B*4, 128)
    x = _conv_block(x, 4, _w(pack_ref, "conv3"), _b(bias, "conv3"))   # (B*2, 128)
    x = _conv_block(x, 2, _w(pack_ref, "conv4"), _b(bias, "conv4"))   # (B*1, 128)

    wav_mean = x                                   # time length 1 -> mean(dim=2) = x
    combine = jnp.concatenate([wav_mean, txt], axis=1)         # (B, 256)

    # ---- both MLP heads fused into 3 block-diagonal matmuls ----
    h1 = jnp.dot(combine, _w(pack_ref, "mlp1"),
                 preferred_element_type=jnp.float32) + _b(bias, "mlp1")   # (B, 128)
    h2 = jnp.dot(h1, _w(pack_ref, "mlp2"),
                 preferred_element_type=jnp.float32) + _b(bias, "mlp2")   # (B, 64)
    out_ref[...] = jnp.dot(h2, _w(pack_ref, "mlp3"),
                           preferred_element_type=jnp.float32) + _b(bias, "mlp3")


# ------------------------------ wrapper ---------------------------------------
@jax.jit
def crnn10_v2_forward(wav_embed, text_embed, pack):
    emb = jnp.concatenate([wav_embed, text_embed], axis=1)     # one (B, 2D) input
    vmem = pl.BlockSpec(memory_space=pltpu.MemorySpace.VMEM)
    out = pl.pallas_call(
        crnn10_v2_kernel,
        out_shape=jax.ShapeDtypeStruct((B, LANES), jnp.float32),
        in_specs=[vmem, vmem],
        out_specs=vmem,
    )(emb, pack)
    return out[:, OUT1_LANE:OUT1_LANE + 1], out[:, OUT2_LANE:OUT2_LANE + 1]


# -------------------------- host-side parameter packing ------------------------
def pack_params(params):
    """Pack all 20 per-layer arrays into one bf16 (PACK_ROWS, 128) slab."""
    (w1, b1, w2, b2, w3, b3, w4, b4,
     ow1, ob1, ow2, ob2, ow3, ob3,
     tw1, tb1, tw2, tb2, tw3, tb3) = params

    def conv_im2col(w):     # (3, Cin, Cout) -> (3*128, 128); tap k at rows k*128
        out = jnp.zeros((3 * LANES, LANES), jnp.float32)
        for k in range(3):
            out = out.at[k * LANES:k * LANES + w.shape[1], :w.shape[2]].set(w[k])
        return out

    conv1 = jnp.zeros((D, LANES), jnp.float32)
    conv1 = conv1.at[:, 0:C1].set(w1[1] + w1[2])               # t=0   (left zero pad)
    conv1 = conv1.at[:, C1:2 * C1].set(w1[0] + w1[1] + w1[2])  # interior rows
    conv1 = conv1.at[:, 2 * C1:3 * C1].set(w1[0] + w1[1])      # t=15  (right zero pad)

    mlp1 = jnp.zeros((C4 + D, 2 * H1), jnp.float32)
    mlp1 = mlp1.at[0:C4, 0:H1].set(ow1)
    mlp1 = mlp1.at[:, H1:2 * H1].set(tw1)
    mlp2 = jnp.zeros((2 * H1, 2 * H2), jnp.float32)
    mlp2 = mlp2.at[0:H1, 0:H2].set(ow2)
    mlp2 = mlp2.at[H1:2 * H1, H2:2 * H2].set(tw2)
    mlp3 = jnp.zeros((2 * H2, LANES), jnp.float32)
    mlp3 = mlp3.at[0:H2, OUT1_LANE:OUT1_LANE + 1].set(ow3)
    mlp3 = mlp3.at[H2:2 * H2, OUT2_LANE:OUT2_LANE + 1].set(tw3)

    mats = {"conv1": conv1, "conv2": conv_im2col(w2), "conv3": conv_im2col(w3),
            "conv4": conv_im2col(w4), "mlp1": mlp1, "mlp2": mlp2, "mlp3": mlp3}

    pack = jnp.zeros((PACK_ROWS, LANES), jnp.float32)
    for name, (r0, rows, cols) in _W_LAYOUT.items():
        m = mats[name]
        assert m.shape == (rows, cols), (name, m.shape, rows, cols)
        pack = pack.at[r0:r0 + rows, 0:cols].set(m)

    def bias_row(segments):
        row = jnp.zeros((LANES,), jnp.float32)
        for off, vec in segments:
            v = vec.reshape(-1)
            row = row.at[off:off + v.shape[0]].set(v)
        return row

    brows = {
        "conv1": bias_row([(0, b1), (C1, b1), (2 * C1, b1)]),
        "conv2": bias_row([(0, b2)]),
        "conv3": bias_row([(0, b3)]),
        "conv4": bias_row([(0, b4)]),
        "mlp1": bias_row([(0, ob1), (H1, tb1)]),
        "mlp2": bias_row([(0, ob2), (H2, tb2)]),
        "mlp3": bias_row([(OUT1_LANE, ob3), (OUT2_LANE, tb3)]),
    }
    for name, (i, _) in _B_LAYOUT.items():
        pack = pack.at[W_ROWS + i, :].set(brows[name])

    return pack.astype(jnp.bfloat16)     # bf16 slab halves the weight DMA


# ----------------------- deterministic parameter init -------------------------
def init_params(key):
    def w(k, shape, fan_in):
        return jax.random.normal(k, shape, jnp.float32) / jnp.sqrt(float(fan_in))

    def bias(k, n):
        return 0.1 * jax.random.normal(k, (1, n), jnp.float32)

    ks = iter(jax.random.split(key, 24))
    params = (
        w(next(ks), (3, D, C1), 3 * D),   bias(next(ks), C1),   # conv_block1
        w(next(ks), (3, C1, C2), 3 * C1), bias(next(ks), C2),   # conv_block2
        w(next(ks), (3, C2, C3), 3 * C2), bias(next(ks), C3),   # conv_block3
        w(next(ks), (3, C3, C4), 3 * C3), bias(next(ks), C4),   # conv_block4
        w(next(ks), (C4, H1), C4),        bias(next(ks), H1),   # overall_mlp_layer1
        w(next(ks), (H1, H2), H1),        bias(next(ks), H2),   # overall_mlp_layer2
        w(next(ks), (H2, 1), H2),         bias(next(ks), 1),    # overall_mlp_layer3
        w(next(ks), (C4 + D, H1), C4 + D), bias(next(ks), H1),  # textual_mlp_layer1
        w(next(ks), (H1, H2), H1),        bias(next(ks), H2),   # textual_mlp_layer2
        w(next(ks), (H2, 1), H2),         bias(next(ks), 1),    # textual_mlp_layer3
    )
    return params


def round_params_bf16(params):
    """Round parameters to bf16 values (the kernel stores them in bf16)."""
    return tuple(p.astype(jnp.bfloat16).astype(jnp.float32) for p in params)


# --------------------------- pure-JAX reference -------------------------------
def reference_forward(wav_embed, text_embed, params):
    (w1, b1, w2, b2, w3, b3, w4, b4,
     ow1, ob1, ow2, ob2, ow3, ob3,
     tw1, tb1, tw2, tb2, tw3, tb3) = params

    def block(x, w, b):  # x: (B, C, L) NCW like PyTorch
        w_oiw = jnp.transpose(w, (2, 1, 0))               # (Cout, Cin, K)
        y = jax.lax.conv_general_dilated(
            x, w_oiw, window_strides=(1,), padding=((1, 1),),
            dimension_numbers=("NCH", "OIH", "NCH"))
        y = y + b.reshape(1, -1, 1)
        y = jnp.maximum(y, 0.0)
        b_, c_, l_ = y.shape
        return jnp.max(y.reshape(b_, c_, l_ // 2, 2), axis=3)

    x = jnp.repeat(wav_embed[:, :, None], L, axis=2)      # (B, D, L)
    x = block(x, w1, b1); x = block(x, w2, b2)
    x = block(x, w3, b3); x = block(x, w4, b4)
    wav_mean = jnp.mean(x, axis=2)                        # (B, C4)
    combine = jnp.concatenate([wav_mean, text_embed], axis=1)
    out1 = ((wav_mean @ ow1 + ob1) @ ow2 + ob2) @ ow3 + ob3
    out2 = ((combine @ tw1 + tb1) @ tw2 + tb2) @ tw3 + tb3
    return out1, out2


if __name__ == "__main__":
    key = jax.random.PRNGKey(0)
    k_wav, k_txt, k_par = jax.random.split(key, 3)
    # TODO(synk): stand-ins for the upstream (CLAP) audio / text embeddings.
    wav_embed = jax.random.normal(k_wav, (B, D), jnp.float32)
    text_embed = jax.random.normal(k_txt, (B, D), jnp.float32)
    params = round_params_bf16(init_params(k_par))   # bf16-representable weights
    pack = pack_params(params)                       # packed once, reused every call

    out1, out2 = crnn10_v2_forward(wav_embed, text_embed, pack)
    jax.block_until_ready((out1, out2))

    ref1, ref2 = reference_forward(wav_embed, text_embed, params)
    assert out1.shape == (B, 1) and out2.shape == (B, 1)
    # Tolerance covers the bf16 re-rounding of conv1's pre-combined taps.
    assert jnp.allclose(out1, ref1, atol=2e-2, rtol=2e-2), (out1, ref1)
    assert jnp.allclose(out2, ref2, atol=2e-2, rtol=2e-2), (out2, ref2)
    print("KERNEL_OK")
</pallas_src>

<mosaic_0001>
module attributes {stable_mosaic.version = 11 : i64} {
  func.func @crnn10_v2_kernel(%arg0: memref<2x256xf32, #tpu.memory_space<vmem>>, %arg1: memref<1744x128xbf16, #tpu.memory_space<vmem>>, %arg2: memref<2x128xf32, #tpu.memory_space<vmem>>) attributes {dimension_semantics = [], scalar_prefetch = 0 : i64, scratch_operands = 0 : i64, tpu.core_type = #tpu.core_type<tc>} {
    %c0 = arith.constant 0 : index
    %c0_0 = arith.constant 0 : index
    %0 = vector.load %arg0[%c0, %c0_0] : memref<2x256xf32, #tpu.memory_space<vmem>>, vector<2x128xf32>
    %c0_1 = arith.constant 0 : index
    %c128 = arith.constant 128 : index
    %1 = vector.load %arg0[%c0_1, %c128] : memref<2x256xf32, #tpu.memory_space<vmem>>, vector<2x128xf32>
    %c1728 = arith.constant 1728 : index
    %c0_2 = arith.constant 0 : index
    %2 = vector.load %arg1[%c1728, %c0_2] : memref<1744x128xbf16, #tpu.memory_space<vmem>>, vector<8x128xbf16>
    %3 = arith.extf %2 : vector<8x128xbf16> to vector<8x128xf32>
    %c0_3 = arith.constant 0 : index
    %c0_4 = arith.constant 0 : index
    %4 = vector.load %arg1[%c0_3, %c0_4] : memref<1744x128xbf16, #tpu.memory_space<vmem>>, vector<128x128xbf16>
    %5 = arith.extf %4 : vector<128x128xbf16> to vector<128x128xf32>
    %cst = arith.constant dense<0.000000e+00> : vector<2x128xf32>
    %6 = tpu.matmul %0, %5, %cst {dimension_numbers = #tpu.dot_dimension_numbers<[1], [0], [0], [1], [0, 0, 1, 1], [], []>} : vector<2x128xf32>, vector<128x128xf32>, vector<2x128xf32> -> vector<2x128xf32>
    %7 = vector.extract_strided_slice %3 {offsets = [0, 0], sizes = [1, 128], strides = [1, 1]} : vector<8x128xf32> to vector<1x128xf32>
    %8 = vector.broadcast %7 : vector<1x128xf32> to vector<2x128xf32>
    %9 = arith.addf %6, %8 : vector<2x128xf32>
    %cst_5 = arith.constant 0.000000e+00 : f32
    %10 = vector.broadcast %cst_5 : f32 to vector<2x128xf32>
    %11 = arith.maximumf %9, %10 : vector<2x128xf32>
    %c16_i32 = arith.constant 16 : i32
    %12 = tpu.dynamic_rotate %11 by %c16_i32 dim 1 : vector<2x128xf32>, i32 -> vector<2x128xf32>
    %c112_i32 = arith.constant 112 : i32
    %13 = tpu.dynamic_rotate %11 by %c112_i32 dim 1 : vector<2x128xf32>, i32 -> vector<2x128xf32>
    %14 = arith.maximumf %12, %13 : vector<2x128xf32>
    %c32_i32 = arith.constant 32 : i32
    %15 = tpu.dynamic_rotate %11 by %c32_i32 dim 1 : vector<2x128xf32>, i32 -> vector<2x128xf32>
    %c96_i32 = arith.constant 96 : i32
    %16 = tpu.dynamic_rotate %11 by %c96_i32 dim 1 : vector<2x128xf32>, i32 -> vector<2x128xf32>
    %17 = arith.maximumf %15, %16 : vector<2x128xf32>
    %18 = tpu.iota {dimensions = array<i32: 1>} : vector<2x128xi32>
    %c16_i32_6 = arith.constant 16 : i32
    %19 = vector.broadcast %c16_i32_6 : i32 to vector<2x128xi32>
    %20 = arith.cmpi slt, %18, %19 : vector<2x128xi32>
    %21 = arith.maximumf %11, %14 : vector<2x128xf32>
    %cst_7 = arith.constant 0.000000e+00 : f32
    %22 = vector.broadcast %cst_7 : f32 to vector<2x128xf32>
    %23 = arith.select %20, %21, %22 : vector<2x128xi1>, vector<2x128xf32>
    %cst_8 = arith.constant 0.000000e+00 : f32
    %24 = vector.broadcast %cst_8 : f32 to vector<2x128xf32>
    %25 = arith.select %20, %14, %24 : vector<2x128xi1>, vector<2x128xf32>
    %26 = arith.maximumf %14, %17 : vector<2x128xf32>
    %cst_9 = arith.constant 0.000000e+00 : f32
    %27 = vector.broadcast %cst_9 : f32 to vector<2x128xf32>
    %28 = arith.select %20, %26, %27 : vector<2x128xi1>, vector<2x128xf32>
    %29 = vector.extract_strided_slice %23 {offsets = [0, 0], sizes = [1, 128], strides = [1, 1]} : vector<2x128xf32> to vector<1x128xf32>
    %30 = vector.extract_strided_slice %25 {offsets = [0, 0], sizes = [1, 128], strides = [1, 1]} : vector<2x128xf32> to vector<1x128xf32>
    %31 = vector.shape_cast %30 : vector<1x128xf32> to vector<1x128xf32>
    %32 = vector.broadcast %31 : vector<1x128xf32> to vector<6x128xf32>
    %33 = vector.extract_strided_slice %28 {offsets = [0, 0], sizes = [1, 128], strides = [1, 1]} : vector<2x128xf32> to vector<1x128xf32>
    %34 = vector.extract_strided_slice %23 {offsets = [1, 0], sizes = [1, 128], strides = [1, 1]} : vector<2x128xf32> to vector<1x128xf32>
    %35 = vector.extract_strided_slice %25 {offsets = [1, 0], sizes = [1, 128], strides = [1, 1]} : vector<2x128xf32> to vector<1x128xf32>
    %36 = vector.shape_cast %35 : vector<1x128xf32> to vector<1x128xf32>
    %37 = vector.broadcast %36 : vector<1x128xf32> to vector<6x128xf32>
    %38 = vector.extract_strided_slice %28 {offsets = [1, 0], sizes = [1, 128], strides = [1, 1]} : vector<2x128xf32> to vector<1x128xf32>
    %39 = tpu.concatenate %29, %32, %33, %34, %37, %38 in 0 : vector<1x128xf32>, vector<6x128xf32>, vector<1x128xf32>, vector<1x128xf32>, vector<6x128xf32>, vector<1x128xf32> -> vector<16x128xf32>
    %c128_10 = arith.constant 128 : index
    %c0_11 = arith.constant 0 : index
    %40 = vector.load %arg1[%c128_10, %c0_11] : memref<1744x128xbf16, #tpu.memory_space<vmem>>, vector<384x128xbf16>
    %41 = arith.extf %40 : vector<384x128xbf16> to vector<384x128xf32>
    %42 = vector.extract_strided_slice %3 {offsets = [1, 0], sizes = [1, 128], strides = [1, 1]} : vector<8x128xf32> to vector<1x128xf32>
    %cst_12 = arith.constant 0.000000e+00 : f32
    %43 = vector.broadcast %cst_12 : f32 to vector<1x128xf32>
    %44 = vector.extract_strided_slice %39 {offsets = [0, 0], sizes = [15, 128], strides = [1, 1]} : vector<16x128xf32> to vector<15x128xf32>
    %45 = tpu.concatenate %43, %44 in 0 : vector<1x128xf32>, vector<15x128xf32> -> vector<16x128xf32>
    %46 = vector.extract_strided_slice %39 {offsets = [1, 0], sizes = [15, 128], strides = [1, 1]} : vector<16x128xf32> to vector<15x128xf32>
    %47 = tpu.concatenate %46, %43 in 0 : vector<15x128xf32>, vector<1x128xf32> -> vector<16x128xf32>
    %48 = tpu.iota {dimensions = array<i32: 0>} : vector<16x128xi32>
    %c8_i32 = arith.constant 8 : i32
    %c0_i32 = arith.constant 0 : i32
    %49 = arith.cmpi eq, %c8_i32, %c0_i32 : i32
    %c1_i32 = arith.constant 1 : i32
    %50 = arith.select %49, %c1_i32, %c8_i32 : i32
    %51 = vector.broadcast %50 : i32 to vector<16x128xi32>
    %52 = arith.remsi %48, %51 : vector<16x128xi32>
    %c0_i32_13 = arith.constant 0 : i32
    %53 = vector.broadcast %c0_i32_13 : i32 to vector<16x128xi32>
    %54 = arith.cmpi ne, %52, %53 : vector<16x128xi32>
    %c0_i32_14 = arith.constant 0 : i32
    %55 = vector.broadcast %c0_i32_14 : i32 to vector<16x128xi32>
    %56 = arith.cmpi slt, %52, %55 : vector<16x128xi32>
    %c0_i32_15 = arith.constant 0 : i32
    %57 = arith.cmpi slt, %50, %c0_i32_15 : i32
    %58 = vector.broadcast %57 : i1 to vector<16x128xi1>
    %59 = vector.broadcast %58 : vector<16x128xi1> to vector<16x128xi1>
    %60 = arith.xori %56, %59 : vector<16x128xi1>
    %61 = arith.andi %60, %54 : vector<16x128xi1>
    %62 = vector.broadcast %50 : i32 to vector<16x128xi32>
    %63 = arith.addi %52, %62 : vector<16x128xi32>
    %64 = arith.select %61, %63, %52 : vector<16x128xi1>, vector<16x128xi32>
    %c0_i32_16 = arith.constant 0 : i32
    %65 = vector.broadcast %c0_i32_16 : i32 to vector<16x128xi32>
    %66 = arith.cmpi eq, %64, %65 : vector<16x128xi32>
    %cst_17 = arith.constant 0.000000e+00 : f32
    %67 = vector.broadcast %cst_17 : f32 to vector<16x128xf32>
    %68 = arith.select %66, %67, %45 : vector<16x128xi1>, vector<16x128xf32>
    %c7_i32 = arith.constant 7 : i32
    %69 = vector.broadcast %c7_i32 : i32 to vector<16x128xi32>
    %70 = arith.cmpi eq, %64, %69 : vector<16x128xi32>
    %cst_18 = arith.constant 0.000000e+00 : f32
    %71 = vector.broadcast %cst_18 : f32 to vector<16x128xf32>
    %72 = arith.select %70, %71, %47 : vector<16x128xi1>, vector<16x128xf32>
    %73 = tpu.concatenate %68, %39, %72 in 1 : vector<16x128xf32>, vector<16x128xf32>, vector<16x128xf32> -> vector<16x384xf32>
    %cst_19 = arith.constant dense<0.000000e+00> : vector<16x128xf32>
    %74 = tpu.matmul %73, %41, %cst_19 {dimension_numbers = #tpu.dot_dimension_numbers<[1], [0], [0], [1], [0, 0, 1, 1], [], []>} : vector<16x384xf32>, vector<384x128xf32>, vector<16x128xf32> -> vector<16x128xf32>
    %75 = vector.broadcast %42 : vector<1x128xf32> to vector<16x128xf32>
    %76 = arith.addf %74, %75 : vector<16x128xf32>
    %cst_20 = arith.constant 0.000000e+00 : f32
    %77 = vector.broadcast %cst_20 : f32 to vector<16x128xf32>
    %78 = arith.maximumf %76, %77 : vector<16x128xf32>
    %79 = vector.extract_strided_slice %78 {offsets = [0, 0], sizes = [1, 128], strides = [1, 1]} : vector<16x128xf32> to vector<1x128xf32>
    %80 = vector.extract_strided_slice %78 {offsets = [1, 0], sizes = [1, 128], strides = [1, 1]} : vector<16x128xf32> to vector<1x128xf32>
    %81 = arith.maximumf %79, %80 : vector<1x128xf32>
    %82 = vector.extract_strided_slice %78 {offsets = [2, 0], sizes = [1, 128], strides = [1, 1]} : vector<16x128xf32> to vector<1x128xf32>
    %83 = vector.extract_strided_slice %78 {offsets = [3, 0], sizes = [1, 128], strides = [1, 1]} : vector<16x128xf32> to vector<1x128xf32>
    %84 = arith.maximumf %82, %83 : vector<1x128xf32>
    %85 = vector.extract_strided_slice %78 {offsets = [4, 0], sizes = [1, 128], strides = [1, 1]} : vector<16x128xf32> to vector<1x128xf32>
    %86 = vector.extract_strided_slice %78 {offsets = [5, 0], sizes = [1, 128], strides = [1, 1]} : vector<16x128xf32> to vector<1x128xf32>
    %87 = arith.maximumf %85, %86 : vector<1x128xf32>
    %88 = vector.extract_strided_slice %78 {offsets = [6, 0], sizes = [1, 128], strides = [1, 1]} : vector<16x128xf32> to vector<1x128xf32>
    %89 = vector.extract_strided_slice %78 {offsets = [7, 0], sizes = [1, 128], strides = [1, 1]} : vector<16x128xf32> to vector<1x128xf32>
    %90 = arith.maximumf %88, %89 : vector<1x128xf32>
    %91 = vector.extract_strided_slice %78 {offsets = [8, 0], sizes = [1, 128], strides = [1, 1]} : vector<16x128xf32> to vector<1x128xf32>
    %92 = vector.extract_strided_slice %78 {offsets = [9, 0], sizes = [1, 128], strides = [1, 1]} : vector<16x128xf32> to vector<1x128xf32>
    %93 = arith.maximumf %91, %92 : vector<1x128xf32>
    %94 = vector.extract_strided_slice %78 {offsets = [10, 0], sizes = [1, 128], strides = [1, 1]} : vector<16x128xf32> to vector<1x128xf32>
    %95 = vector.extract_strided_slice %78 {offsets = [11, 0], sizes = [1, 128], strides = [1, 1]} : vector<16x128xf32> to vector<1x128xf32>
    %96 = arith.maximumf %94, %95 : vector<1x128xf32>
    %97 = vector.extract_strided_slice %78 {offsets = [12, 0], sizes = [1, 128], strides = [1, 1]} : vector<16x128xf32> to vector<1x128xf32>
    %98 = vector.extract_strided_slice %78 {offsets = [13, 0], sizes = [1, 128], strides = [1, 1]} : vector<16x128xf32> to vector<1x128xf32>
    %99 = arith.maximumf %97, %98 : vector<1x128xf32>
    %100 = vector.extract_strided_slice %78 {offsets = [14, 0], sizes = [1, 128], strides = [1, 1]} : vector<16x128xf32> to vector<1x128xf32>
    %101 = vector.extract_strided_slice %78 {offsets = [15, 0], sizes = [1, 128], strides = [1, 1]} : vector<16x128xf32> to vector<1x128xf32>
    %102 = arith.maximumf %100, %101 : vector<1x128xf32>
    %103 = tpu.concatenate %81, %84, %87, %90, %93, %96, %99, %102 in 0 : vector<1x128xf32>, vector<1x128xf32>, vector<1x128xf32>, vector<1x128xf32>, vector<1x128xf32>, vector<1x128xf32>, vector<1x128xf32>, vector<1x128xf32> -> vector<8x128xf32>
    %c512 = arith.constant 512 : index
    %c0_21 = arith.constant 0 : index
    %104 = vector.load %arg1[%c512, %c0_21] : memref<1744x128xbf16, #tpu.memory_space<vmem>>, vector<384x128xbf16>
    %105 = arith.extf %104 : vector<384x128xbf16> to vector<384x128xf32>
    %106 = vector.extract_strided_slice %3 {offsets = [2, 0], sizes = [1, 128], strides = [1, 1]} : vector<8x128xf32> to vector<1x128xf32>
    %cst_22 = arith.constant 0.000000e+00 : f32
    %107 = vector.broadcast %cst_22 : f32 to vector<1x128xf32>
    %108 = vector.extract_strided_slice %103 {offsets = [0, 0], sizes = [7, 128], strides = [1, 1]} : vector<8x128xf32> to vector<7x128xf32>
    %109 = tpu.concatenate %107, %108 in 0 : vector<1x128xf32>, vector<7x128xf32> -> vector<8x128xf32>
    %110 = vector.extract_strided_slice %103 {offsets = [1, 0], sizes = [7, 128], strides = [1, 1]} : vector<8x128xf32> to vector<7x128xf32>
    %111 = tpu.concatenate %110, %107 in 0 : vector<7x128xf32>, vector<1x128xf32> -> vector<8x128xf32>
    %112 = tpu.iota {dimensions = array<i32: 0>} : vector<8x128xi32>
    %c4_i32 = arith.constant 4 : i32
    %c0_i32_23 = arith.constant 0 : i32
    %113 = arith.cmpi eq, %c4_i32, %c0_i32_23 : i32
    %c1_i32_24 = arith.constant 1 : i32
    %114 = arith.select %113, %c1_i32_24, %c4_i32 : i32
    %115 = vector.broadcast %114 : i32 to vector<8x128xi32>
    %116 = arith.remsi %112, %115 : vector<8x128xi32>
    %c0_i32_25 = arith.constant 0 : i32
    %117 = vector.broadcast %c0_i32_25 : i32 to vector<8x128xi32>
    %118 = arith.cmpi ne, %116, %117 : vector<8x128xi32>
    %c0_i32_26 = arith.constant 0 : i32
    %119 = vector.broadcast %c0_i32_26 : i32 to vector<8x128xi32>
    %120 = arith.cmpi slt, %116, %119 : vector<8x128xi32>
    %c0_i32_27 = arith.constant 0 : i32
    %121 = arith.cmpi slt, %114, %c0_i32_27 : i32
    %122 = vector.broadcast %121 : i1 to vector<8x128xi1>
    %123 = vector.broadcast %122 : vector<8x128xi1> to vector<8x128xi1>
    %124 = arith.xori %120, %123 : vector<8x128xi1>
    %125 = arith.andi %124, %118 : vector<8x128xi1>
    %126 = vector.broadcast %114 : i32 to vector<8x128xi32>
    %127 = arith.addi %116, %126 : vector<8x128xi32>
    %128 = arith.select %125, %127, %116 : vector<8x128xi1>, vector<8x128xi32>
    %c0_i32_28 = arith.constant 0 : i32
    %129 = vector.broadcast %c0_i32_28 : i32 to vector<8x128xi32>
    %130 = arith.cmpi eq, %128, %129 : vector<8x128xi32>
    %cst_29 = arith.constant 0.000000e+00 : f32
    %131 = vector.broadcast %cst_29 : f32 to vector<8x128xf32>
    %132 = arith.select %130, %131, %109 : vector<8x128xi1>, vector<8x128xf32>
    %c3_i32 = arith.constant 3 : i32
    %133 = vector.broadcast %c3_i32 : i32 to vector<8x128xi32>
    %134 = arith.cmpi eq, %128, %133 : vector<8x128xi32>
    %cst_30 = arith.constant 0.000000e+00 : f32
    %135 = vector.broadcast %cst_30 : f32 to vector<8x128xf32>
    %136 = arith.select %134, %135, %111 : vector<8x128xi1>, vector<8x128xf32>
    %137 = tpu.concatenate %132, %103, %136 in 1 : vector<8x128xf32>, vector<8x128xf32>, vector<8x128xf32> -> vector<8x384xf32>
    %cst_31 = arith.constant dense<0.000000e+00> : vector<8x128xf32>
    %138 = tpu.matmul %137, %105, %cst_31 {dimension_numbers = #tpu.dot_dimension_numbers<[1], [0], [0], [1], [0, 0, 1, 1], [], []>} : vector<8x384xf32>, vector<384x128xf32>, vector<8x128xf32> -> vector<8x128xf32>
    %139 = vector.broadcast %106 : vector<1x128xf32> to vector<8x128xf32>
    %140 = arith.addf %138, %139 : vector<8x128xf32>
    %cst_32 = arith.constant 0.000000e+00 : f32
    %141 = vector.broadcast %cst_32 : f32 to vector<8x128xf32>
    %142 = arith.maximumf %140, %141 : vector<8x128xf32>
    %143 = vector.extract_strided_slice %142 {offsets = [0, 0], sizes = [1, 128], strides = [1, 1]} : vector<8x128xf32> to vector<1x128xf32>
    %144 = vector.extract_strided_slice %142 {offsets = [1, 0], sizes = [1, 128], strides = [1, 1]} : vector<8x128xf32> to vector<1x128xf32>
    %145 = arith.maximumf %143, %144 : vector<1x128xf32>
    %146 = vector.extract_strided_slice %142 {offsets = [2, 0], sizes = [1, 128], strides = [1, 1]} : vector<8x128xf32> to vector<1x128xf32>
    %147 = vector.extract_strided_slice %142 {offsets = [3, 0], sizes = [1, 128], strides = [1, 1]} : vector<8x128xf32> to vector<1x128xf32>
    %148 = arith.maximumf %146, %147 : vector<1x128xf32>
    %149 = vector.extract_strided_slice %142 {offsets = [4, 0], sizes = [1, 128], strides = [1, 1]} : vector<8x128xf32> to vector<1x128xf32>
    %150 = vector.extract_strided_slice %142 {offsets = [5, 0], sizes = [1, 128], strides = [1, 1]} : vector<8x128xf32> to vector<1x128xf32>
    %151 = arith.maximumf %149, %150 : vector<1x128xf32>
    %152 = vector.extract_strided_slice %142 {offsets = [6, 0], sizes = [1, 128], strides = [1, 1]} : vector<8x128xf32> to vector<1x128xf32>
    %153 = vector.extract_strided_slice %142 {offsets = [7, 0], sizes = [1, 128], strides = [1, 1]} : vector<8x128xf32> to vector<1x128xf32>
    %154 = arith.maximumf %152, %153 : vector<1x128xf32>
    %155 = tpu.concatenate %145, %148, %151, %154 in 0 : vector<1x128xf32>, vector<1x128xf32>, vector<1x128xf32>, vector<1x128xf32> -> vector<4x128xf32>
    %c896 = arith.constant 896 : index
    %c0_33 = arith.constant 0 : index
    %156 = vector.load %arg1[%c896, %c0_33] : memref<1744x128xbf16, #tpu.memory_space<vmem>>, vector<384x128xbf16>
    %157 = arith.extf %156 : vector<384x128xbf16> to vector<384x128xf32>
    %158 = vector.extract_strided_slice %3 {offsets = [3, 0], sizes = [1, 128], strides = [1, 1]} : vector<8x128xf32> to vector<1x128xf32>
    %cst_34 = arith.constant 0.000000e+00 : f32
    %159 = vector.broadcast %cst_34 : f32 to vector<1x128xf32>
    %160 = vector.extract_strided_slice %155 {offsets = [0, 0], sizes = [3, 128], strides = [1, 1]} : vector<4x128xf32> to vector<3x128xf32>
    %161 = tpu.concatenate %159, %160 in 0 : vector<1x128xf32>, vector<3x128xf32> -> vector<4x128xf32>
    %162 = vector.extract_strided_slice %155 {offsets = [1, 0], sizes = [3, 128], strides = [1, 1]} : vector<4x128xf32> to vector<3x128xf32>
    %163 = tpu.concatenate %162, %159 in 0 : vector<3x128xf32>, vector<1x128xf32> -> vector<4x128xf32>
    %164 = tpu.iota {dimensions = array<i32: 0>} : vector<4x128xi32>
    %c2_i32 = arith.constant 2 : i32
    %c0_i32_35 = arith.constant 0 : i32
    %165 = arith.cmpi eq, %c2_i32, %c0_i32_35 : i32
    %c1_i32_36 = arith.constant 1 : i32
    %166 = arith.select %165, %c1_i32_36, %c2_i32 : i32
    %167 = vector.broadcast %166 : i32 to vector<4x128xi32>
    %168 = arith.remsi %164, %167 : vector<4x128xi32>
    %c0_i32_37 = arith.constant 0 : i32
    %169 = vector.broadcast %c0_i32_37 : i32 to vector<4x128xi32>
    %170 = arith.cmpi ne, %168, %169 : vector<4x128xi32>
    %c0_i32_38 = arith.constant 0 : i32
    %171 = vector.broadcast %c0_i32_38 : i32 to vector<4x128xi32>
    %172 = arith.cmpi slt, %168, %171 : vector<4x128xi32>
    %c0_i32_39 = arith.constant 0 : i32
    %173 = arith.cmpi slt, %166, %c0_i32_39 : i32
    %174 = vector.broadcast %173 : i1 to vector<4x128xi1>
    %175 = vector.broadcast %174 : vector<4x128xi1> to vector<4x128xi1>
    %176 = arith.xori %172, %175 : vector<4x128xi1>
    %177 = arith.andi %176, %170 : vector<4x128xi1>
    %178 = vector.broadcast %166 : i32 to vector<4x128xi32>
    %179 = arith.addi %168, %178 : vector<4x128xi32>
    %180 = arith.select %177, %179, %168 : vector<4x128xi1>, vector<4x128xi32>
    %c0_i32_40 = arith.constant 0 : i32
    %181 = vector.broadcast %c0_i32_40 : i32 to vector<4x128xi32>
    %182 = arith.cmpi eq, %180, %181 : vector<4x128xi32>
    %cst_41 = arith.constant 0.000000e+00 : f32
    %183 = vector.broadcast %cst_41 : f32 to vector<4x128xf32>
    %184 = arith.select %182, %183, %161 : vector<4x128xi1>, vector<4x128xf32>
    %c1_i32_42 = arith.constant 1 : i32
    %185 = vector.broadcast %c1_i32_42 : i32 to vector<4x128xi32>
    %186 = arith.cmpi eq, %180, %185 : vector<4x128xi32>
    %cst_43 = arith.constant 0.000000e+00 : f32
    %187 = vector.broadcast %cst_43 : f32 to vector<4x128xf32>
    %188 = arith.select %186, %187, %163 : vector<4x128xi1>, vector<4x128xf32>
    %189 = tpu.concatenate %184, %155, %188 in 1 : vector<4x128xf32>, vector<4x128xf32>, vector<4x128xf32> -> vector<4x384xf32>
    %cst_44 = arith.constant dense<0.000000e+00> : vector<4x128xf32>
    %190 = tpu.matmul %189, %157, %cst_44 {dimension_numbers = #tpu.dot_dimension_numbers<[1], [0], [0], [1], [0, 0, 1, 1], [], []>} : vector<4x384xf32>, vector<384x128xf32>, vector<4x128xf32> -> vector<4x128xf32>
    %191 = vector.broadcast %158 : vector<1x128xf32> to vector<4x128xf32>
    %192 = arith.addf %190, %191 : vector<4x128xf32>
    %cst_45 = arith.constant 0.000000e+00 : f32
    %193 = vector.broadcast %cst_45 : f32 to vector<4x128xf32>
    %194 = arith.maximumf %192, %193 : vector<4x128xf32>
    %195 = vector.extract_strided_slice %194 {offsets = [0, 0], sizes = [1, 128], strides = [1, 1]} : vector<4x128xf32> to vector<1x128xf32>
    %196 = vector.extract_strided_slice %194 {offsets = [1, 0], sizes = [1, 128], strides = [1, 1]} : vector<4x128xf32> to vector<1x128xf32>
    %197 = arith.maximumf %195, %196 : vector<1x128xf32>
    %198 = vector.extract_strided_slice %194 {offsets = [2, 0], sizes = [1, 128], strides = [1, 1]} : vector<4x128xf32> to vector<1x128xf32>
    %199 = vector.extract_strided_slice %194 {offsets = [3, 0], sizes = [1, 128], strides = [1, 1]} : vector<4x128xf32> to vector<1x128xf32>
    %200 = arith.maximumf %198, %199 : vector<1x128xf32>
    %201 = tpu.concatenate %197, %200 in 0 : vector<1x128xf32>, vector<1x128xf32> -> vector<2x128xf32>
    %202 = tpu.concatenate %201, %1 in 1 : vector<2x128xf32>, vector<2x128xf32> -> vector<2x256xf32>
    %c1280 = arith.constant 1280 : index
    %c0_46 = arith.constant 0 : index
    %203 = vector.load %arg1[%c1280, %c0_46] : memref<1744x128xbf16, #tpu.memory_space<vmem>>, vector<256x128xbf16>
    %204 = arith.extf %203 : vector<256x128xbf16> to vector<256x128xf32>
    %cst_47 = arith.constant dense<0.000000e+00> : vector<2x128xf32>
    %205 = tpu.matmul %202, %204, %cst_47 {dimension_numbers = #tpu.dot_dimension_numbers<[1], [0], [0], [1], [0, 0, 1, 1], [], []>} : vector<2x256xf32>, vector<256x128xf32>, vector<2x128xf32> -> vector<2x128xf32>
    %206 = vector.extract_strided_slice %3 {offsets = [4, 0], sizes = [1, 128], strides = [1, 1]} : vector<8x128xf32> to vector<1x128xf32>
    %207 = vector.broadcast %206 : vector<1x128xf32> to vector<2x128xf32>
    %208 = arith.addf %205, %207 : vector<2x128xf32>
    %c1536 = arith.constant 1536 : index
    %c0_48 = arith.constant 0 : index
    %209 = vector.load %arg1[%c1536, %c0_48] : memref<1744x128xbf16, #tpu.memory_space<vmem>>, vector<128x64xbf16>
    %210 = arith.extf %209 : vector<128x64xbf16> to vector<128x64xf32>
    %cst_49 = arith.constant dense<0.000000e+00> : vector<2x64xf32>
    %211 = tpu.matmul %208, %210, %cst_49 {dimension_numbers = #tpu.dot_dimension_numbers<[1], [0], [0], [1], [0, 0, 1, 1], [], []>} : vector<2x128xf32>, vector<128x64xf32>, vector<2x64xf32> -> vector<2x64xf32>
    %212 = vector.extract_strided_slice %3 {offsets = [5, 0], sizes = [1, 64], strides = [1, 1]} : vector<8x128xf32> to vector<1x64xf32>
    %213 = vector.broadcast %212 : vector<1x64xf32> to vector<2x64xf32>
    %214 = arith.addf %211, %213 : vector<2x64xf32>
    %c1664 = arith.constant 1664 : index
    %c0_50 = arith.constant 0 : index
    %215 = vector.load %arg1[%c1664, %c0_50] : memref<1744x128xbf16, #tpu.memory_space<vmem>>, vector<64x128xbf16>
    %216 = arith.extf %215 : vector<64x128xbf16> to vector<64x128xf32>
    %cst_51 = arith.constant dense<0.000000e+00> : vector<2x128xf32>
    %217 = tpu.matmul %214, %216, %cst_51 {dimension_numbers = #tpu.dot_dimension_numbers<[1], [0], [0], [1], [0, 0, 1, 1], [], []>} : vector<2x64xf32>, vector<64x128xf32>, vector<2x128xf32> -> vector<2x128xf32>
    %218 = vector.extract_strided_slice %3 {offsets = [6, 0], sizes = [1, 128], strides = [1, 1]} : vector<8x128xf32> to vector<1x128xf32>
    %219 = vector.broadcast %218 : vector<1x128xf32> to vector<2x128xf32>
    %220 = arith.addf %217, %219 : vector<2x128xf32>
    %c0_52 = arith.constant 0 : index
    %c0_53 = arith.constant 0 : index
    %221 = vector.load %arg2[%c0_52, %c0_53] : memref<2x128xf32, #tpu.memory_space<vmem>>, vector<2x128xf32>
    tpu.vector_store %arg2[%c0_52, %c0_53], %220 {strides = array<i32>} : memref<2x128xf32, #tpu.memory_space<vmem>>, vector<2x128xf32>,
    return
  }
}

</mosaic_0001>

<bundles_post_ra>
// kernel: crnn10_v2_forward.1
= control target key start
LH: loop header
LB: loop body
LE: loop exit
PB: predicated region body
PF: predicated region fallthrough
CT: control target
= control target key end

     0   :  { %7 = vsyncpa [#allocation3], 0  ;;  %s1558_s12 = smov [#allocation2]   ;;  %s1559_s14 = smov 64   ;;  %s1642_s0 = inlined_call_operand.vmem [shape: f32[2,256], index: 0, kind: input, shape index: {}]   ;;  %s1643_s1 = inlined_call_operand.hbm [shape: bf16[1744,128], index: 1, kind: input, shape index: {}]   ;;  %s1644_s2 = inlined_call_operand.vmem [shape: f32[2,128], index: 2, kind: output, shape index: {}]  }
   0x1   :  { %s14_s11 = sshll.u32 %s1643_s1, 4  ;;  %s16_s13 = sshll.u32 %s1558_s12, 4  ;;  %s15_s11 = int_to_ptr.hbm [resolvable:$true] %s14_s11  ;;  %s17_s13 = int_to_ptr.vmem [resolvable:$true] %s16_s13 }
   0x2   :  { %s1560_s15 = smov 4  }
   0x3   :  { %22 = dma.hbm_to_vmem [thread:$0]  %s15_s11, 13952, %s17_s13, [#allocation3], %s1559_s14, %s1559_s14, %s1560_s15  }
   0x4   :  { %1556 = dma.done.wait [#allocation3], 13952  }
   0x5   :  { %1557 = vsyncadd [#allocation3], 4294953344  ;;  %v1416_v0 = vld [vmem:[#allocation2 + $0x38] sm:$0xff]   ;;  %v1415_v1 = vld [vmem:[#allocation2 + $0x30] sm:$0xff]   ;;  %s1561_s17 = smov 32   ;;  %s1562_s18 = smov 16  }
   0x6   :  { %v1009_v2 = vunpack.c.h.bf16 %v1416_v0  ;;  %v1008_v3 = vunpack.c.l.bf16 %v1416_v0  ;;  %v1005_v4 = vunpack.c.h.bf16 %v1415_v1  ;;  %v1414_v5 = vld [vmem:[#allocation2 + $0x28] sm:$0xff]   ;;  %v1004_v6 = vunpack.c.l.bf16 %v1415_v1  ;;  %v1413_v8 = vld [vmem:[#allocation2 + $0x20] sm:$0xff]   ;;  %v1412_v11 = vld [vmem:[#allocation2 + $0x18] sm:$0xff]   ;;  %s1563_s19 = smov 96   ;;  %s1564_s20 = smov 112  }
   0x7   :  { %v1001_v7 = vunpack.c.h.bf16 %v1414_v5  ;;  %v1000_v9 = vunpack.c.l.bf16 %v1414_v5  ;;  %v997_v10 = vunpack.c.h.bf16 %v1413_v8  ;;  %v996_v12 = vunpack.c.l.bf16 %v1413_v8  ;;  %v1411_v14 = vld [vmem:[#allocation2 + $0x10] sm:$0xff]   ;;  %v1410_v17 = vld [vmem:[#allocation2 + $0x8] sm:$0xff]   ;;  %v979_v20 = vld [vmem:[#allocation2] sm:$0xff]  }
   0x8   :  { %64 = vmatpush.msra.mxu0 %v1009_v2  ;;  %v993_v13 = vunpack.c.h.bf16 %v1412_v11  ;;  %v992_v15 = vunpack.c.l.bf16 %v1412_v11  ;;  %v989_v16 = vunpack.c.h.bf16 %v1411_v14  ;;  %v988_v18 = vunpack.c.l.bf16 %v1411_v14  ;;  %v27_v24 = vld [vmem:[%s1642_s0] sm:$0x3]  ;;  %v1432_v25 = vld [vmem:[#allocation2 + $0xb8] sm:$0xff]   ;;  %v1431_v27 = vld [vmem:[#allocation2 + $0xb0] sm:$0xff]  }
   0x9   :  { %v985_v19 = vunpack.c.h.bf16 %v1410_v17  ;;  %v984_v21 = vunpack.c.l.bf16 %v1410_v17  ;;  %v981_v22 = vunpack.c.h.bf16 %v979_v20  ;;  %v980_v23 = vunpack.c.l.bf16 %v979_v20  ;;  %v1424_v26 = vld [vmem:[#allocation2 + $0x78] sm:$0xff]   ;;  %v1423_v32 = vld [vmem:[#allocation2 + $0x70] sm:$0xff]   ;;  %v1430_v39 = vld [vmem:[#allocation2 + $0xa8] sm:$0xff]  }
   0xa   :  { %65 = vmatpush.msra.mxu0 %v1008_v3  ;;  %v1073_v28 = vunpack.c.h.bf16 %v1432_v25  ;;  %v1072_v29 = vunpack.c.l.bf16 %v1432_v25  ;;  %v1041_v30 = vunpack.c.h.bf16 %v1424_v26  ;;  %v1440_v31 = vld [vmem:[#allocation2 + $0xf8] sm:$0xff]   ;;  %v1040_v34 = vunpack.c.l.bf16 %v1424_v26  ;;  %v1439_v36 = vld [vmem:[#allocation2 + $0xf0] sm:$0xff]   ;;  %v1422_v41 = vld [vmem:[#allocation2 + $0x68] sm:$0xff]  }
   0xb   :  { %v1105_v33 = vunpack.c.h.bf16 %v1440_v31  ;;  %v1104_v35 = vunpack.c.l.bf16 %v1440_v31  ;;  %v1069_v37 = vunpack.c.h.bf16 %v1431_v27  ;;  %v1037_v38 = vunpack.c.h.bf16 %v1423_v32  ;;  %v1438_v44 = vld [vmem:[#allocation2 + $0xe8] sm:$0xff]   ;;  %v1429_v48 = vld [vmem:[#allocation2 + $0xa0] sm:$0xff]   ;;  %v1428_v63 = vld [vmem:[#allocation2 + $0x98] sm:$0xff]  }
   0xc   :  { %66 = vmatpush.msra.mxu0 %v1005_v4  ;;  %288 = vmatpush.msra.mxu2 %v1073_v28  ;;  %v1101_v40 = vunpack.c.h.bf16 %v1439_v36  ;;  %v1068_v42 = vunpack.c.l.bf16 %v1431_v27  ;;  %v1036_v43 = vunpack.c.l.bf16 %v1423_v32  ;;  %v1100_v45 = vunpack.c.l.bf16 %v1439_v36  ;;  %v29_v50 = vld [vmem:[#allocation2 + $0x360] sm:$0xf]  ;;  %v1420_v5 = vld [vmem:[#allocation2 + $0x58] sm:$0xff]   ;;  %v1426_v17 = vld [vmem:[#allocation2 + $0x88] sm:$0xff]  }
   0xd   :  { %265 = vmatpush.msra.mxu1 %v1041_v30  ;;  %311 = vmatpush.msra.mxu3 %v1105_v33  ;;  %v1065_v46 = vunpack.c.h.bf16 %v1430_v39  ;;  %v1033_v47 = vunpack.c.h.bf16 %v1422_v41  ;;  %v1097_v49 = vunpack.c.h.bf16 %v1438_v44  ;;  %v1064_v51 = vunpack.c.l.bf16 %v1430_v39  ;;  %v1421_v61 = vld [vmem:[#allocation2 + $0x60] sm:$0xff]   ;;  %v1434_v27 = vld [vmem:[#allocation2 + $0xc8] sm:$0xff]   ;;  %v1460_v39 = vld [vmem:[#allocation2 + $0x178] sm:$0xff]  }
   0xe   :  { %67 = vmatpush.msra.mxu0 %v1004_v6  ;;  %289 = vmatpush.msra.mxu2 %v1072_v29  ;;  %v1032_v52 = vunpack.c.l.bf16 %v1422_v41  ;;  %v1096_v53 = vunpack.c.l.bf16 %v1438_v44  ;;  %v1061_v54 = vunpack.c.h.bf16 %v1429_v48  ;;  %v1586_v55 = vunpack.c.l.bf16 %v29_v50  ;;  %v1437_v0 = vld [vmem:[#allocation2 + $0xe0] sm:$0xff]   ;;  %v1427_v6 = vld [vmem:[#allocation2 + $0x90] sm:$0xff]  }
   0xf   :  { %266 = vmatpush.msra.mxu1 %v1040_v34  ;;  %312 = vmatpush.msra.mxu3 %v1104_v35  ;;  %v1060_v56 = vunpack.c.l.bf16 %v1429_v48  ;;  %v1029_v62 = vunpack.c.h.bf16 %v1421_v61  ;;  %v1057_v1 = vunpack.c.h.bf16 %v1428_v63  ;;  %v1093_v2 = vunpack.c.h.bf16 %v1437_v0  ;;  %v1425_v26 = vld [vmem:[#allocation2 + $0x80] sm:$0xff]  }
  0x10   :  { %68 = vmatpush.msra.mxu0 %v1001_v7  ;;  %290 = vmatpush.msra.mxu2 %v1069_v37  ;;  %v63_v57 = vperm.slane %v1586_v55, 0  ;;  %v1028_v3 = vunpack.c.l.bf16 %v1421_v61  ;;  %v1056_v4 = vunpack.c.l.bf16 %v1428_v63  ;;  %v1436_v7 = vld [vmem:[#allocation2 + $0xd8] sm:$0xff]   ;;  %v1092_v8 = vunpack.c.l.bf16 %v1437_v0  ;;  %v1417_v33 = vld [vmem:[#allocation2 + $0x40] sm:$0xff]  }
  0x11   :  { %267 = vmatpush.msra.mxu1 %v1037_v38  ;;  %313 = vmatpush.msra.mxu3 %v1101_v40  ;;  %v1089_v11 = vunpack.c.h.bf16 %v1436_v7  ;;  %v1088_v14 = vunpack.c.l.bf16 %v1436_v7  ;;  %v1045_v28 = vunpack.c.h.bf16 %v1425_v26  ;;  %v1081_v29 = vunpack.c.h.bf16 %v1434_v27  ;;  %v1433_v35 = vld [vmem:[#allocation2 + $0xc0] sm:$0xff]  }
  0x12   :  { %69 = vmatpush.msra.mxu0 %v1000_v9  ;;  %291 = vmatpush.msra.mxu2 %v1068_v42  ;;  %v1025_v9 = vunpack.c.h.bf16 %v1420_v5  ;;  %v1044_v31 = vunpack.c.l.bf16 %v1425_v26  ;;  %v1080_v32 = vunpack.c.l.bf16 %v1434_v27  ;;  %v1013_v34 = vunpack.c.h.bf16 %v1417_v33  ;;  %v1458_v26 = vld [vmem:[#allocation2 + $0x168] sm:$0xff]  }
  0x13   :  { %268 = vmatpush.msra.mxu1 %v1036_v43  ;;  %314 = vmatpush.msra.mxu3 %v1100_v45  ;;  %v1077_v36 = vunpack.c.h.bf16 %v1433_v35  ;;  %v1012_v37 = vunpack.c.l.bf16 %v1417_v33  ;;  %v1076_v38 = vunpack.c.l.bf16 %v1433_v35  ;;  %v1169_v40 = vunpack.c.h.bf16 %v1460_v39  ;;  %v1457_v35 = vld [vmem:[#allocation2 + $0x160] sm:$0xff]  }
  0x14   :  { %70 = vmatpush.msra.mxu0 %v997_v10  ;;  %292 = vmatpush.msra.mxu2 %v1065_v46  ;;  %v1053_v10 = vunpack.c.h.bf16 %v1427_v6  ;;  %v95_v43 = vlaneseq  ;;  %vm113_vm1 = vcmask 1040384   ;;  %vm115_vm2 = vcmask 1046528  }
  0x15   :  { %269 = vmatpush.msra.mxu1 %v1033_v47  ;;  %315 = vmatpush.msra.mxu3 %v1097_v49  ;;  %v1161_v27 = vunpack.c.h.bf16 %v1458_v26  ;;  %vm361_vm7 = vcmask 1041408   ;;  %vm363_vm8 = vcmask 1042432   ;;  %vm365_vm9 = vcmask 1043456  }
  0x16   :  { %71 = vmatpush.msra.mxu0 %v996_v12  ;;  %293 = vmatpush.msra.mxu2 %v1064_v51  ;;  %v1024_v12 = vunpack.c.l.bf16 %v1420_v5  ;;  %v96_v44 = vand.u32 127, %v95_v43  ;;  %v1595_v47 = vshrl.u32 %v95_v43, 7  ;;  %vm367_vm10 = vcmask 1044480  }
  0x17   :  { %270 = vmatpush.msra.mxu1 %v1032_v52  ;;  %316 = vmatpush.msra.mxu3 %v1096_v53  ;;  %vm369_vm11 = vcmask 1045504  }
  0x18   :  { %72 = vmatpush.msra.mxu0 %v993_v13  ;;  %294 = vmatpush.msra.mxu2 %v1061_v54  ;;  %v1052_v13 = vunpack.c.l.bf16 %v1427_v6  ;;  %vm97_vm0 = vcmp.lt.s32.totalorder %v96_v44, 16  ;;  %v236_v54 = vand.u32 7, %v1595_v47  ;;  %v1456_v44 = vld [vmem:[#allocation2 + $0x158] sm:$0xff]  }
  0x19   :  { %271 = vmatpush.msra.mxu1 %v1029_v62  ;;  %317 = vmatpush.msra.mxu3 %v1093_v2 }
  0x1a   :  { %73 = vmatpush.msra.mxu0 %v992_v15  ;;  %295 = vmatpush.msra.mxu2 %v1060_v56  ;;  %v1419_v15 = vld [vmem:[#allocation2 + $0x50] sm:$0xff]   ;;  %vm1441_vm3 = vcmp.ne.s32.totalorder %v236_v54, 0  ;;  %vm1443_vm4 = vcmp.ne.s32.totalorder %v236_v54, 7 }
  0x1b   :  { %272 = vmatpush.msra.mxu1 %v1028_v3  ;;  %318 = vmatpush.msra.mxu3 %v1092_v8  ;;  %v1455_v54 = vld [vmem:[#allocation2 + $0x150] sm:$0xff]  }
  0x1c   :  { %74 = vmatpush.msra.mxu0 %v989_v16  ;;  %296 = vmatpush.msra.mxu2 %v1057_v1  ;;  %v1021_v16 = vunpack.c.h.bf16 %v1419_v15 }
  0x1d   :  { %273 = vmatpush.msra.mxu1 %v1025_v9  ;;  %319 = vmatpush.msra.mxu3 %v1089_v11 }
  0x1e   :  { %75 = vmatpush.msra.mxu0 %v988_v18  ;;  %297 = vmatpush.msra.mxu2 %v1056_v4  ;;  %v1435_v18 = vld [vmem:[#allocation2 + $0xd0] sm:$0xff]   ;;  %v231_v4 = vadd.s32 8, %v1595_v47 }
  0x1f   :  { %274 = vmatpush.msra.mxu1 %v1024_v12  ;;  %320 = vmatpush.msra.mxu3 %v1088_v14  ;;  %v1085_v20 = vunpack.c.h.bf16 %v1435_v18  ;;  %v1168_v12 = vunpack.c.l.bf16 %v1460_v39  ;;  %v1468_v14 = vld [vmem:[#allocation2 + $0x1b8] sm:$0xff]   ;;  %v1156_v39 = vunpack.c.l.bf16 %v1457_v35 }
  0x20   :  { %76 = vmatpush.msra.mxu0 %v985_v19  ;;  %298 = vmatpush.msra.mxu2 %v1053_v10  ;;  %v1049_v19 = vunpack.c.h.bf16 %v1426_v17  ;;  %v243_v8 = vand.u32 7, %v231_v4 }
  0x21   :  { %275 = vmatpush.msra.mxu1 %v1021_v16  ;;  %321 = vmatpush.msra.mxu3 %v1085_v20  ;;  %v1201_v16 = vunpack.c.h.bf16 %v1468_v14  ;;  %v1200_v20 = vunpack.c.l.bf16 %v1468_v14 }
  0x22   :  { %77 = vmatpush.msra.mxu0 %v984_v21  ;;  %299 = vmatpush.msra.mxu2 %v1052_v13  ;;  %v1020_v21 = vunpack.c.l.bf16 %v1419_v15  ;;  %vm1442_vm5 = vcmp.ne.s32.totalorder %v243_v8, 0  ;;  %vm1444_vm6 = vcmp.ne.s32.totalorder %v243_v8, 7  ;;  %v1452_v13 = vld [vmem:[#allocation2 + $0x138] sm:$0xff]  }
  0x23   :  { %v1137_v15 = vunpack.c.h.bf16 %v1452_v13 }
  0x24   :  { %78 = vmatpush.msra.mxu0 %v981_v22  ;;  %300 = vmatpush.msra.mxu2 %v1049_v19  ;;  %v1048_v22 = vunpack.c.l.bf16 %v1426_v17  ;;  %v1459_v17 = vld [vmem:[#allocation2 + $0x170] sm:$0xff]   ;;  %v1136_v19 = vunpack.c.l.bf16 %v1452_v13 }
  0x25   :  { %276 = vmatpush.msra.mxu1 %v1020_v21  ;;  %v1164_v21 = vunpack.c.l.bf16 %v1459_v17 }
  0x26   :  { %79 = vmatpush.msra.mxu0 %v980_v23  ;;  %v1084_v23 = vunpack.c.l.bf16 %v1435_v18  ;;  %301 = vmatpush.msra.mxu2 %v1048_v22  ;;  %v1165_v18 = vunpack.c.h.bf16 %v1459_v17  ;;  %v1451_v22 = vld [vmem:[#allocation2 + $0x130] sm:$0xff]  }
  0x27   :  { %80 = vmatmul.f32.vlgmr.msra.gmra.mxu0 %v27_v24  ;;  %v1418_v24 = vld [vmem:[#allocation2 + $0x48] sm:$0xff]  }
  0x28   :  { %v1017_v25 = vunpack.c.h.bf16 %v1418_v24  ;;  %322 = vmatpush.msra.mxu3 %v1084_v23  ;;  %v1016_v30 = vunpack.c.l.bf16 %v1418_v24  ;;  %302 = vmatpush.msra.mxu2 %v1045_v28  ;;  %v1467_v23 = vld [vmem:[#allocation2 + $0x1b0] sm:$0xff]   ;;  %v1133_v24 = vunpack.c.h.bf16 %v1451_v22  ;;  %v1132_v28 = vunpack.c.l.bf16 %v1451_v22 }
  0x29   :  { %492 = vmatpush.msrb.mxu0 %v1137_v15 }
  0x2a   :  { %277 = vmatpush.msra.mxu1 %v1017_v25  ;;  %323 = vmatpush.msra.mxu3 %v1081_v29  ;;  %v1197_v25 = vunpack.c.h.bf16 %v1467_v23  ;;  %v1196_v29 = vunpack.c.l.bf16 %v1467_v23  ;;  %v1486_v23 = vld [vmem:[#allocation2 + $0x238] sm:$0xff]  }
  0x2b   :  { %303 = vmatpush.msra.mxu2 %v1044_v31  ;;  %493 = vmatpush.msrb.mxu0 %v1136_v19  ;;  %v1450_v31 = vld [vmem:[#allocation2 + $0x128] sm:$0xff]  }
  0x2c   :  { %278 = vmatpush.msra.mxu1 %v1016_v30  ;;  %324 = vmatpush.msra.mxu3 %v1080_v32  ;;  %v1160_v30 = vunpack.c.l.bf16 %v1458_v26  ;;  %v1466_v32 = vld [vmem:[#allocation2 + $0x1a8] sm:$0xff]   ;;  %v1129_v33 = vunpack.c.h.bf16 %v1450_v31  ;;  %v1265_v26 = vunpack.c.h.bf16 %v1486_v23 }
  0x2d   :  { %532 = vmatpush.msrb.mxu2 %v1201_v16  ;;  %494 = vmatpush.msrb.mxu0 %v1133_v24  ;;  %v1461_v16 = vld [vmem:[#allocation2 + $0x180] sm:$0xff]   ;;  %v1478_v24 = vld [vmem:[#allocation2 + $0x1f8] sm:$0xff]  }
  0x2e   :  { %279 = vmatpush.msra.mxu1 %v1013_v34  ;;  %325 = vmatpush.msra.mxu3 %v1077_v36  ;;  %v1193_v34 = vunpack.c.h.bf16 %v1466_v32  ;;  %v1157_v36 = vunpack.c.h.bf16 %v1457_v35  ;;  %v1173_v17 = vunpack.c.h.bf16 %v1461_v16 }
  0x2f   :  { %533 = vmatpush.msrb.mxu2 %v1200_v20  ;;  %495 = vmatpush.msrb.mxu0 %v1132_v28  ;;  %v1172_v20 = vunpack.c.l.bf16 %v1461_v16  ;;  %v1233_v28 = vunpack.c.h.bf16 %v1478_v24 }
  0x30   :  { %280 = vmatpush.msra.mxu1 %v1012_v37  ;;  %326 = vmatpush.msra.mxu3 %v1076_v38  ;;  %v1128_v37 = vunpack.c.l.bf16 %v1450_v31  ;;  %v1192_v38 = vunpack.c.l.bf16 %v1466_v32  ;;  %v1609_v31 = vld [vmem:[#allocation2 + $0x1f0] sm:$0xff]  }
  0x31   :  { %534 = vmatpush.msrb.mxu2 %v1197_v25  ;;  %496 = vmatpush.msrb.mxu0 %v1129_v33  ;;  %v1494_v25 = vld [vmem:[#allocation2 + $0x278] sm:$0xff]   ;;  %v1611_v32 = vld [vmem:[#allocation2 + $0x270] sm:$0xff]  }
  0x32   :  { %512 = vmatpush.msrb.mxu1 %v1169_v40  ;;  %v1449_v40 = vld [vmem:[#allocation2 + $0x120] sm:$0xff]   ;;  %v1296_v35 = vunpack.c.l.bf16 %v1494_v25  ;;  %687 = vmatpush.msrb.mxu3 %v1233_v28  ;;  %v1482_v28 = vld [vmem:[#allocation2 + $0x218] sm:$0xff]  }
  0x33   :  { %535 = vmatpush.msrb.mxu2 %v1196_v29  ;;  %497 = vmatpush.msrb.mxu0 %v1128_v37  ;;  %v1297_v29 = vunpack.c.h.bf16 %v1494_v25  ;;  %v1229_v37 = vunpack.c.h.bf16 %v1609_v31 }
  0x34   :  { %513 = vmatpush.msrb.mxu1 %v1168_v12  ;;  %v1445_v12 = vld [vmem:[#allocation2 + $0x100] sm:$0xff]  }
  0x35   :  { %536 = vmatpush.msrb.mxu2 %v1193_v34  ;;  %v1109_v15 = vunpack.c.h.bf16 %v1445_v12  ;;  %v1108_v19 = vunpack.c.l.bf16 %v1445_v12  ;;  %v1232_v34 = vunpack.c.l.bf16 %v1478_v24  ;;  %v1484_v12 = vld [vmem:[#allocation2 + $0x228] sm:$0xff]  }
  0x36   :  { %514 = vmatpush.msrb.mxu1 %v1165_v18  ;;  %v264_v18 = vperm.slane %v1586_v55, 1  ;;  %v1256_v16 = vunpack.c.l.bf16 %v1484_v12 }
  0x37   :  { %537 = vmatpush.msrb.mxu2 %v1192_v38  ;;  %v1293_v38 = vunpack.c.h.bf16 %v1611_v32  ;;  %688 = vmatpush.msrb.mxu3 %v1232_v34  ;;  %v1248_v34 = vunpack.c.l.bf16 %v1482_v28 }
  0x38   :  { %515 = vmatpush.msrb.mxu1 %v1164_v21 }
  0x39   :  { %689 = vmatpush.msrb.mxu3 %v1229_v37 }
  0x3a   :  { %516 = vmatpush.msrb.mxu1 %v1161_v27  ;;  %v1264_v27 = vunpack.c.l.bf16 %v1486_v23 }
  0x3c   :  { %517 = vmatpush.msrb.mxu1 %v1160_v30  ;;  %v1485_v30 = vld [vmem:[#allocation2 + $0x230] sm:$0xff]  }
  0x3e   :  { %518 = vmatpush.msrb.mxu1 %v1157_v36  ;;  %v1261_v36 = vunpack.c.h.bf16 %v1485_v30 }
  0x40   :  { %519 = vmatpush.msrb.mxu1 %v1156_v39 }
  0xa4   :  { %v81_v58 = vpop.f32.mrf.mxu0 }
  0xa5   :  { %v82_v59 = vadd.f32 %v81_v58, %v63_v57 }
  0xa7   :  { %v1589_v60 = vmax.f32 %v82_v59, 0.0 }
  0xa9   :  { %90 = vrot.lane.b32.xlu1 %v1589_v60, %s1561_s17  ;;  %85 = vrot.lane.b32.xlu0 %v1589_v60, %s1562_s18 }
  0xb1   :  { %92 = vrot.lane.b32.xlu1 %v1589_v60, %s1563_s19  ;;  %87 = vrot.lane.b32.xlu0 %v1589_v60, %s1564_s20 }
 0x11b   :  { %v91_v41 = vpop.permute.xlu1 %90  ;;  %v86_v42 = vpop.permute.xlu0 %85 }
 0x123   :  { %v93_v45 = vpop.permute.xlu1 %92  ;;  %v88_v46 = vpop.permute.xlu0 %87 }
 0x124   :  { %v94_v48 = vmax.f32 %v91_v41, %v93_v45  ;;  %v89_v49 = vmax.f32 %v86_v42, %v88_v46  ;;  %v1465_v41 = vld [vmem:[#allocation2 + $0x1a0] sm:$0xff]   ;;  %v1125_v42 = vunpack.c.h.bf16 %v1449_v40  ;;  %v1153_v45 = vunpack.c.h.bf16 %v1456_v44 }
 0x125   :  { %v1189_v43 = vunpack.c.h.bf16 %v1465_v41  ;;  %v1124_v46 = vunpack.c.l.bf16 %v1449_v40  ;;  %v1260_v40 = vunpack.c.l.bf16 %v1485_v30 }
 0x126   :  { %v98_v50 = vmax.f32 %v1589_v60, %v89_v49  ;;  %v100_v51 = vsel %vm97_vm0, %v89_v49, 0.0  ;;  %v101_v52 = vmax.f32 %v89_v49, %v94_v48  ;;  %498 = vmatpush.msrb.mxu0 %v1125_v42  ;;  %v1188_v48 = vunpack.c.l.bf16 %v1465_v41  ;;  %520 = vmatpush.msrb.mxu1 %v1153_v45 }
 0x127   :  { %v103_v53 = vperm.slane %v100_v51, 0  ;;  %v104_v57 = vperm.slane %v100_v51, 1  ;;  %538 = vmatpush.msrb.mxu2 %v1189_v43  ;;  %v1152_v49 = vunpack.c.l.bf16 %v1456_v44  ;;  %v1464_v51 = vld [vmem:[#allocation2 + $0x198] sm:$0xff]  }
 0x128   :  { %v102_v56 = vsel %vm97_vm0, %v101_v52, 0.0  ;;  %v99_v58 = vsel %vm97_vm0, %v98_v50, 0.0  ;;  %v1448_v50 = vld [vmem:[#allocation2 + $0x118] sm:$0xff]   ;;  %499 = vmatpush.msrb.mxu0 %v1124_v46  ;;  %vm931_vm0 = vcmask 523264  }
 0x129   :  { %v111_v59 = vrot.slane %v102_v56, 2  ;;  %v106_v61 = vrot.slane %v102_v56, 1  ;;  %v109_v62 = vrot.slane %v99_v58, 1  ;;  %v114_v63 = vsel %vm113_vm1, %v99_v58, %v103_v53  ;;  %539 = vmatpush.msrb.mxu2 %v1188_v48  ;;  %521 = vmatpush.msrb.mxu1 %v1152_v49 }
 0x12a   :  { %v1121_v52 = vunpack.c.h.bf16 %v1448_v50  ;;  %v1185_v53 = vunpack.c.h.bf16 %v1464_v51  ;;  %v1149_v56 = vunpack.c.h.bf16 %v1455_v54  ;;  %v1184_v58 = vunpack.c.l.bf16 %v1464_v51 }
 0x12b   :  { %v116_v0 = vsel %vm115_vm2, %v114_v63, %v106_v61  ;;  %v117_v60 = vsel %vm113_vm1, %v109_v62, %v104_v57  ;;  %v1120_v57 = vunpack.c.l.bf16 %v1448_v50  ;;  %v1447_v61 = vld [vmem:[#allocation2 + $0x110] sm:$0xff]  }
 0x12c   :  { %v223_v1 = vrot.slane %v116_v0, 1  ;;  %304 = vmatmul.f32.vlgmr.msra.gmra.mxu2 %v116_v0  ;;  %v217_v2 = vrot.slane %v116_v0, 7  ;;  %v118_v3 = vsel %vm115_vm2, %v117_v60, %v111_v59  ;;  %500 = vmatpush.msrb.mxu0 %v1121_v52  ;;  %v1148_v59 = vunpack.c.l.bf16 %v1455_v54  ;;  %v1463_v62 = vld [vmem:[#allocation2 + $0x190] sm:$0xff]   ;;  %v1454_v60 = vld [vmem:[#allocation2 + $0x148] sm:$0xff]  }
 0x12d   :  { %v224_v5 = vrot.slane %v118_v3, 1  ;;  %v218_v9 = vrot.slane %v118_v3, 7  ;;  %540 = vmatpush.msrb.mxu2 %v1185_v53  ;;  %522 = vmatpush.msrb.mxu1 %v1149_v56  ;;  %v1117_v63 = vunpack.c.h.bf16 %v1447_v61  ;;  %v1181_v0 = vunpack.c.h.bf16 %v1463_v62 }
 0x12e   :  { %v222_v6 = vsel %vm113_vm1, 0.0, %v217_v2  ;;  %501 = vmatpush.msrb.mxu0 %v1120_v57  ;;  %v1144_v4 = vunpack.c.l.bf16 %v1454_v60 }
 0x12f   :  { %962 = vmatmul.msk.f32.vlgmr.msra.gmra.mxu1 %vm1441_vm3, %v222_v6  ;;  %v225_v7 = vsel %vm115_vm2, %v223_v1, %v224_v5  ;;  %v219_v10 = vsel %vm113_vm1, %v217_v2, %v218_v9  ;;  %v228_v11 = vsel %vm115_vm2, %v224_v5, 0.0  ;;  %541 = vmatpush.msrb.mxu2 %v1184_v58  ;;  %v1145_v1 = vunpack.c.h.bf16 %v1454_v60  ;;  %v1446_v5 = vld [vmem:[#allocation2 + $0x108] sm:$0xff]   ;;  %v1453_v9 = vld [vmem:[#allocation2 + $0x140] sm:$0xff]  }
 0x130   :  { %966 = vmatmul.msk.f32.vlgmr.msra.gmra.mxu3 %vm1443_vm4, %v225_v7  ;;  %523 = vmatpush.msrb.mxu1 %v1148_v59  ;;  %v1116_v2 = vunpack.c.l.bf16 %v1447_v61  ;;  %v1462_v6 = vld [vmem:[#allocation2 + $0x188] sm:$0xff]   ;;  %v1113_v7 = vunpack.c.h.bf16 %v1446_v5  ;;  %v1141_v13 = vunpack.c.h.bf16 %v1453_v9  ;;  %v1140_v14 = vunpack.c.l.bf16 %v1453_v9 }
 0x131   :  { %502 = vmatpush.msrb.mxu0 %v1117_v63  ;;  %542 = vmatpush.msrb.mxu2 %v1181_v0  ;;  %v1177_v8 = vunpack.c.h.bf16 %v1462_v6 }
 0x132   :  { %524 = vmatpush.msrb.mxu1 %v1145_v1 }
 0x133   :  { %503 = vmatpush.msrb.mxu0 %v1116_v2 }
 0x134   :  { %307 = vmatmul.f32.gmra.mxu2 %v118_v3  ;;  %v1180_v3 = vunpack.c.l.bf16 %v1463_v62  ;;  %525 = vmatpush.msrb.mxu1 %v1144_v4 }
 0x135   :  { %504 = vmatpush.msrb.mxu0 %v1113_v7 }
 0x136   :  { %543 = vmatpush.msrb.mxu2 %v1180_v3  ;;  %526 = vmatpush.msrb.mxu1 %v1141_v13  ;;  %v479_v3 = vand.u32 3, %v1595_v47  ;;  %v1257_v13 = vunpack.c.h.bf16 %v1484_v12 }
 0x137   :  { %964 = vmatmul.msk.f32.gmra.mxu1 %vm1442_vm5, %v219_v10  ;;  %v1112_v10 = vunpack.c.l.bf16 %v1446_v5 }
 0x138   :  { %968 = vmatmul.msk.f32.gmra.mxu3 %vm1444_vm6, %v228_v11  ;;  %v1176_v11 = vunpack.c.l.bf16 %v1462_v6  ;;  %544 = vmatpush.msrb.mxu2 %v1177_v8  ;;  %vm1469_vm12 = vcmp.ne.s32.totalorder %v479_v3, 0  ;;  %vm1470_vm13 = vcmp.ne.s32.totalorder %v479_v3, 3 }
 0x139   :  { %505 = vmatpush.msrb.mxu0 %v1112_v10  ;;  %527 = vmatpush.msrb.mxu1 %v1140_v14  ;;  %v1228_v14 = vunpack.c.l.bf16 %v1609_v31  ;;  %v1249_v31 = vunpack.c.h.bf16 %v1482_v28 }
 0x13a   :  { %545 = vmatpush.msrb.mxu2 %v1176_v11 }
 0x13b   :  { %506 = vmatpush.msrb.mxu0 %v1109_v15  ;;  %727 = vmatpush.msra.mxu1 %v1297_v29  ;;  %v1292_v15 = vunpack.c.l.bf16 %v1611_v32 }
 0x13c   :  { %546 = vmatpush.msrb.mxu2 %v1173_v17  ;;  %v1476_v17 = vld [vmem:[#allocation2 + $0x1e8] sm:$0xff]   ;;  %690 = vmatpush.msrb.mxu3 %v1228_v14  ;;  %v491_v14 = vperm.slane %v1586_v55, 2 }
 0x13d   :  { %507 = vmatpush.msrb.mxu0 %v1108_v19  ;;  %728 = vmatpush.msra.mxu1 %v1296_v35  ;;  %v1225_v19 = vunpack.c.h.bf16 %v1476_v17  ;;  %v1224_v23 = vunpack.c.l.bf16 %v1476_v17  ;;  %v1474_v35 = vld [vmem:[#allocation2 + $0x1d8] sm:$0xff]  }
 0x13e   :  { %547 = vmatpush.msrb.mxu2 %v1172_v20  ;;  %v1217_v37 = vunpack.c.h.bf16 %v1474_v35 }
 0x13f   :  { %707 = vmatpush.msra.mxu0 %v1265_v26  ;;  %729 = vmatpush.msra.mxu1 %v1293_v38  ;;  %v1475_v26 = vld [vmem:[#allocation2 + $0x1e0] sm:$0xff]  }
 0x140   :  { %691 = vmatpush.msrb.mxu3 %v1225_v19  ;;  %v1221_v29 = vunpack.c.h.bf16 %v1475_v26  ;;  %v1220_v32 = vunpack.c.l.bf16 %v1475_v26  ;;  %v674_v26 = vand.u32 1, %v1595_v47 }
 0x141   :  { %708 = vmatpush.msra.mxu0 %v1264_v27  ;;  %730 = vmatpush.msra.mxu1 %v1292_v15  ;;  %v1491_v27 = vld [vmem:[#allocation2 + $0x260] sm:$0xff]  }
 0x142   :  { %692 = vmatpush.msrb.mxu3 %v1224_v23  ;;  %v1285_v30 = vunpack.c.h.bf16 %v1491_v27  ;;  %vm1495_vm14 = vcmp.ne.s32.totalorder %v674_v26, 0  ;;  %vm1496_vm15 = vcmp.ne.s32.totalorder %v674_v26, 1 }
 0x143   :  { %709 = vmatpush.msra.mxu0 %v1261_v36  ;;  %v1490_v36 = vld [vmem:[#allocation2 + $0x258] sm:$0xff]  }
 0x144   :  { %693 = vmatpush.msrb.mxu3 %v1221_v29  ;;  %v1281_v38 = vunpack.c.h.bf16 %v1490_v36 }
 0x145   :  { %710 = vmatpush.msra.mxu0 %v1260_v40 }
 0x146   :  { %694 = vmatpush.msrb.mxu3 %v1220_v32 }
 0x147   :  { %711 = vmatpush.msra.mxu0 %v1257_v13 }
 0x148   :  { %695 = vmatpush.msrb.mxu3 %v1217_v37  ;;  %v1502_v37 = vld [vmem:[#allocation2 + $0x2a8] sm:$0xff]  }
 0x149   :  { %712 = vmatpush.msra.mxu0 %v1256_v16 }
 0x1ac   :  { %v282_v21 = vpop.f32.mrf.mxu1 }
 0x1ad   :  { %v283_v22 = vadd.f32 %v282_v21, %v264_v18  ;;  %v1483_v21 = vld [vmem:[#allocation2 + $0x220] sm:$0xff]  }
 0x1ae   :  { %v1252_v25 = vunpack.c.l.bf16 %v1483_v21 }
 0x1af   :  { %v305_v33 = vpop.f32.mrf.mxu2 }
 0x1b0   :  { %v306_v39 = vadd.f32 %v305_v33, %v283_v22  ;;  %v1253_v22 = vunpack.c.h.bf16 %v1483_v21  ;;  %v1284_v33 = vunpack.c.l.bf16 %v1491_v27 }
 0x1b2   :  { %713 = vmatpush.msra.mxu0 %v1253_v22 }
 0x1b3   :  { %v328_v41 = vpop.f32.mrf.mxu3 }
 0x1b4   :  { %v329_v42 = vadd.f32 %v328_v41, %v306_v39  ;;  %v285_v43 = vpop.f32.mrf.mxu1  ;;  %714 = vmatpush.msra.mxu0 %v1252_v25  ;;  %v1481_v39 = vld [vmem:[#allocation2 + $0x210] sm:$0xff]   ;;  %v1216_v41 = vunpack.c.l.bf16 %v1474_v35 }
 0x1b5   :  { %v286_v45 = vadd.f32 %v285_v43, %v264_v18  ;;  %v1492_v18 = vld [vmem:[#allocation2 + $0x268] sm:$0xff]   ;;  %v1245_v40 = vunpack.c.h.bf16 %v1481_v39  ;;  %v1244_v43 = vunpack.c.l.bf16 %v1481_v39  ;;  %v1511_v35 = vld [vmem:[#allocation2 + $0x2f0] sm:$0xff]  }
 0x1b6   :  { %v334_v44 = vmax.f32 %v329_v42, 0.0  ;;  %v1289_v20 = vunpack.c.h.bf16 %v1492_v18  ;;  %v1288_v24 = vunpack.c.l.bf16 %v1492_v18  ;;  %715 = vmatpush.msra.mxu0 %v1249_v31  ;;  %v1280_v42 = vunpack.c.l.bf16 %v1490_v36  ;;  %696 = vmatpush.msrb.mxu3 %v1216_v41 }
 0x1b7   :  { %v308_v46 = vpop.f32.mrf.mxu2  ;;  %v1357_v36 = vunpack.c.h.bf16 %v1511_v35  ;;  %v1356_v39 = vunpack.c.l.bf16 %v1511_v35  ;;  %v1320_v41 = vunpack.c.l.bf16 %v1502_v37 }
 0x1b8   :  { %v337_v48 = vrot.slane %v334_v44, 1  ;;  %v309_v50 = vadd.f32 %v308_v46, %v286_v45  ;;  %731 = vmatpush.msra.mxu1 %v1289_v20  ;;  %716 = vmatpush.msra.mxu0 %v1248_v34  ;;  %v1489_v45 = vld [vmem:[#allocation2 + $0x250] sm:$0xff]  }
 0x1ba   :  { %v339_v49 = vmax.f32 %v334_v44, %v337_v48  ;;  %732 = vmatpush.msra.mxu1 %v1288_v24  ;;  %717 = vmatpush.msra.mxu0 %v1245_v40  ;;  %v1473_v44 = vld [vmem:[#allocation2 + $0x1d0] sm:$0xff]   ;;  %v1277_v48 = vunpack.c.h.bf16 %v1489_v45  ;;  %v1510_v40 = vld [vmem:[#allocation2 + $0x2e8] sm:$0xff]  }
 0x1bb   :  { %v331_v51 = vpop.f32.mrf.mxu3  ;;  %v1213_v46 = vunpack.c.h.bf16 %v1473_v44 }
 0x1bc   :  { %v345_v52 = vrot.slane %v339_v49, 1  ;;  %v332_v53 = vadd.f32 %v331_v51, %v309_v50  ;;  %v347_v54 = vrot.slane %v339_v49, 2  ;;  %v349_v62 = vrot.slane %v339_v49, 3  ;;  %733 = vmatpush.msra.mxu1 %v1285_v30  ;;  %718 = vmatpush.msra.mxu0 %v1244_v43  ;;  %v1501_v43 = vld [vmem:[#allocation2 + $0x2a0] sm:$0xff]  }
 0x1bd   :  { %697 = vmatpush.msrb.mxu3 %v1213_v46  ;;  %v1212_v51 = vunpack.c.l.bf16 %v1473_v44  ;;  %v1352_v44 = vunpack.c.l.bf16 %v1510_v40  ;;  %v1317_v46 = vunpack.c.h.bf16 %v1501_v43 }
 0x1be   :  { %v335_v56 = vmax.f32 %v332_v53, 0.0  ;;  %v360_v57 = vsel %vm113_vm1, %v339_v49, %v345_v52  ;;  %734 = vmatpush.msra.mxu1 %v1284_v33  ;;  %v1480_v49 = vld [vmem:[#allocation2 + $0x208] sm:$0xff]   ;;  %v1276_v52 = vunpack.c.l.bf16 %v1489_v45  ;;  %v1509_v45 = vld [vmem:[#allocation2 + $0x2e0] sm:$0xff]  }
 0x1bf   :  { %v362_v61 = vsel %vm361_vm7, %v360_v57, %v347_v54  ;;  %v1241_v50 = vunpack.c.h.bf16 %v1480_v49  ;;  %v1240_v53 = vunpack.c.l.bf16 %v1480_v49  ;;  %v1472_v54 = vld [vmem:[#allocation2 + $0x1c8] sm:$0xff]   ;;  %698 = vmatpush.msrb.mxu3 %v1212_v51  ;;  %v1349_v49 = vunpack.c.h.bf16 %v1509_v45 }
 0x1c0   :  { %v341_v58 = vrot.slane %v335_v56, 1  ;;  %v364_v60 = vsel %vm363_vm8, %v362_v61, %v349_v62  ;;  %735 = vmatpush.msra.mxu1 %v1281_v38  ;;  %v1209_v57 = vunpack.c.h.bf16 %v1472_v54  ;;  %v1208_v62 = vunpack.c.l.bf16 %v1472_v54 }
 0x1c1   :  { %719 = vmatpush.msra.mxu0 %v1241_v50  ;;  %v1321_v38 = vunpack.c.h.bf16 %v1502_v37  ;;  %v1500_v50 = vld [vmem:[#allocation2 + $0x298] sm:$0xff]  }
 0x1c2   :  { %v343_v59 = vmax.f32 %v335_v56, %v341_v58  ;;  %736 = vmatpush.msra.mxu1 %v1280_v42  ;;  %v1488_v56 = vld [vmem:[#allocation2 + $0x248] sm:$0xff]   ;;  %699 = vmatpush.msrb.mxu3 %v1209_v57  ;;  %v1353_v42 = vunpack.c.h.bf16 %v1510_v40  ;;  %v1313_v51 = vunpack.c.h.bf16 %v1500_v50  ;;  %v1312_v54 = vunpack.c.l.bf16 %v1500_v50  ;;  %v1499_v57 = vld [vmem:[#allocation2 + $0x290] sm:$0xff]  }
 0x1c3   :  { %v1273_v58 = vunpack.c.h.bf16 %v1488_v56  ;;  %720 = vmatpush.msra.mxu0 %v1240_v53  ;;  %v1508_v53 = vld [vmem:[#allocation2 + $0x2d8] sm:$0xff]   ;;  %v1523_v50 = vld [vmem:[#allocation2 + $0x350] sm:$0xff]  }
 0x1c4   :  { %v352_v63 = vrot.slane %v343_v59, 4  ;;  %v354_v0 = vrot.slane %v343_v59, 5  ;;  %v356_v1 = vrot.slane %v343_v59, 6  ;;  %v358_v4 = vrot.slane %v343_v59, 7  ;;  %737 = vmatpush.msra.mxu1 %v1277_v48  ;;  %v1479_v59 = vld [vmem:[#allocation2 + $0x200] sm:$0xff]   ;;  %700 = vmatpush.msrb.mxu3 %v1208_v62 }
 0x1c5   :  { %v1237_v61 = vunpack.c.h.bf16 %v1479_v59  ;;  %v1316_v48 = vunpack.c.l.bf16 %v1501_v43  ;;  %v1308_v62 = vunpack.c.l.bf16 %v1499_v57 }
 0x1c6   :  { %v366_v2 = vsel %vm365_vm9, %v364_v60, %v352_v63  ;;  %738 = vmatpush.msra.mxu1 %v1276_v52  ;;  %v1272_v63 = vunpack.c.l.bf16 %v1488_v56  ;;  %v1471_v60 = vld [vmem:[#allocation2 + $0x1c0] sm:$0xff]   ;;  %v1348_v52 = vunpack.c.l.bf16 %v1509_v45  ;;  %v1345_v56 = vunpack.c.h.bf16 %v1508_v53 }
 0x1c7   :  { %v368_v5 = vsel %vm367_vm10, %v366_v2, %v354_v0  ;;  %v1236_v0 = vunpack.c.l.bf16 %v1479_v59  ;;  %721 = vmatpush.msra.mxu0 %v1237_v61  ;;  %v1487_v2 = vld [vmem:[#allocation2 + $0x240] sm:$0xff]   ;;  %v1344_v59 = vunpack.c.l.bf16 %v1508_v53  ;;  %v1507_v61 = vld [vmem:[#allocation2 + $0x2d0] sm:$0xff]   ;;  %v1405_v53 = vunpack.c.h.bf16 %v1523_v50 }
 0x1c8   :  { %v370_v6 = vsel %vm369_vm11, %v368_v5, %v356_v1  ;;  %739 = vmatpush.msra.mxu1 %v1273_v58  ;;  %v1205_v1 = vunpack.c.h.bf16 %v1471_v60  ;;  %v1269_v3 = vunpack.c.h.bf16 %v1487_v2  ;;  %v1268_v5 = vunpack.c.l.bf16 %v1487_v2  ;;  %v1506_v2 = vld [vmem:[#allocation2 + $0x2c8] sm:$0xff]   ;;  %v1513_v45 = vld [vmem:[#allocation2 + $0x300] sm:$0xff]  }
 0x1c9   :  { %v371_v7 = vsel %vm115_vm2, %v370_v6, %v358_v4  ;;  %722 = vmatpush.msra.mxu0 %v1236_v0  ;;  %v1204_v4 = vunpack.c.l.bf16 %v1471_v60  ;;  %v1504_v6 = vld [vmem:[#allocation2 + $0x2b8] sm:$0xff]   ;;  %v1309_v58 = vunpack.c.h.bf16 %v1499_v57  ;;  %v1498_v0 = vld [vmem:[#allocation2 + $0x288] sm:$0xff]  }
 0x1ca   :  { %v469_v8 = vrot.slane %v371_v7, 7  ;;  %v472_v9 = vrot.slane %v371_v7, 1  ;;  %528 = vmatmul.f32.vlgmr.msrb.gmra.mxu1 %v371_v7  ;;  %701 = vmatpush.msrb.mxu3 %v1205_v1  ;;  %v1512_v7 = vld [vmem:[#allocation2 + $0x2f8] sm:$0xff]   ;;  %v1305_v60 = vunpack.c.h.bf16 %v1498_v0  ;;  %v1340_v1 = vunpack.c.l.bf16 %v1507_v61 }
 0x1cb   :  { %740 = vmatpush.msra.mxu1 %v1272_v63  ;;  %v1360_v12 = vunpack.c.l.bf16 %v1512_v7  ;;  %v1341_v63 = vunpack.c.h.bf16 %v1507_v61 }
 0x1cc   :  { %v471_v10 = vsel %vm113_vm1, 0.0, %v469_v8  ;;  %v474_v11 = vsel %vm115_vm2, %v472_v9, 0.0  ;;  %702 = vmatpush.msrb.mxu3 %v1204_v4  ;;  %v1503_v8 = vld [vmem:[#allocation2 + $0x2b0] sm:$0xff]   ;;  %v1329_v9 = vunpack.c.h.bf16 %v1504_v6  ;;  %v1337_v4 = vunpack.c.h.bf16 %v1506_v2 }
 0x1cd   :  { %970 = vmatmul.msk.f32.vlgmr.msrb.gmra.mxu0 %vm1469_vm12, %v471_v10  ;;  %972 = vmatmul.msk.f32.vlgmr.msrb.gmra.mxu2 %vm1470_vm13, %v474_v11  ;;  %v1328_v10 = vunpack.c.l.bf16 %v1504_v6  ;;  %v1361_v11 = vunpack.c.h.bf16 %v1512_v7  ;;  %v1325_v13 = vunpack.c.h.bf16 %v1503_v8  ;;  %v1324_v47 = vunpack.c.l.bf16 %v1503_v8 }
 0x1ce   :  { %741 = vmatpush.msra.mxu1 %v1269_v3  ;;  %821 = vmatpush.msra.mxu2 %v1329_v9  ;;  %v1304_v3 = vunpack.c.l.bf16 %v1498_v0  ;;  %v1336_v7 = vunpack.c.l.bf16 %v1506_v2  ;;  %v1505_v9 = vld [vmem:[#allocation2 + $0x2c0] sm:$0xff]  }
 0x1cf   :  { %841 = vmatpush.msra.mxu3 %v1361_v11  ;;  %v1332_v11 = vunpack.c.l.bf16 %v1505_v9 }
 0x1d0   :  { %742 = vmatpush.msra.mxu1 %v1268_v5  ;;  %822 = vmatpush.msra.mxu2 %v1328_v10  ;;  %v1497_v5 = vld [vmem:[#allocation2 + $0x280] sm:$0xff]   ;;  %v1333_v10 = vunpack.c.h.bf16 %v1505_v9 }
 0x1d1   :  { %842 = vmatpush.msra.mxu3 %v1360_v12  ;;  %v1301_v6 = vunpack.c.h.bf16 %v1497_v5  ;;  %v1300_v8 = vunpack.c.l.bf16 %v1497_v5  ;;  %v28_v12 = vld [vmem:[%s1642_s0 + $0x2] sm:$0x3] }
 0x1d2   :  { %823 = vmatpush.msra.mxu2 %v1325_v13  ;;  %v1520_v13 = vld [vmem:[#allocation2 + $0x338] sm:$0xff]  }
 0x1d3   :  { %843 = vmatpush.msra.mxu3 %v1357_v36 }
 0x1d4   :  { %824 = vmatpush.msra.mxu2 %v1324_v47  ;;  %v1514_v47 = vld [vmem:[#allocation2 + $0x308] sm:$0xff]  }
 0x1d5   :  { %844 = vmatpush.msra.mxu3 %v1356_v39  ;;  %v1369_v39 = vunpack.c.h.bf16 %v1514_v47 }
 0x1d6   :  { %825 = vmatpush.msra.mxu2 %v1321_v38 }
 0x1d7   :  { %845 = vmatpush.msra.mxu3 %v1353_v42 }
 0x1d8   :  { %826 = vmatpush.msra.mxu2 %v1320_v41 }
 0x1d9   :  { %846 = vmatpush.msra.mxu3 %v1352_v44  ;;  %v1368_v44 = vunpack.c.l.bf16 %v1514_v47 }
 0x1da   :  { %827 = vmatpush.msra.mxu2 %v1317_v46  ;;  %v1365_v46 = vunpack.c.h.bf16 %v1513_v45 }
 0x1db   :  { %847 = vmatpush.msra.mxu3 %v1349_v49  ;;  %v1524_v49 = vld [vmem:[#allocation2 + $0x358] sm:$0xff]  }
 0x1dc   :  { %828 = vmatpush.msra.mxu2 %v1316_v48  ;;  %v1364_v48 = vunpack.c.l.bf16 %v1513_v45 }
 0x1dd   :  { %848 = vmatpush.msra.mxu3 %v1348_v52  ;;  %v1408_v52 = vunpack.c.l.bf16 %v1524_v49 }
 0x1de   :  { %829 = vmatpush.msra.mxu2 %v1313_v51  ;;  %v1409_v51 = vunpack.c.h.bf16 %v1524_v49 }
 0x1df   :  { %849 = vmatpush.msra.mxu3 %v1345_v56  ;;  %v1404_v56 = vunpack.c.l.bf16 %v1523_v50 }
 0x1e0   :  { %830 = vmatpush.msra.mxu2 %v1312_v54  ;;  %943 = vmatpush.msrb.mxu1 %v1409_v51  ;;  %v1522_v54 = vld [vmem:[#allocation2 + $0x348] sm:$0xff]  }
 0x1e1   :  { %850 = vmatpush.msra.mxu3 %v1344_v59  ;;  %v1401_v57 = vunpack.c.h.bf16 %v1522_v54  ;;  %v820_v59 = vperm.slane %v1586_v55, 4 }
 0x1e2   :  { %831 = vmatpush.msra.mxu2 %v1309_v58  ;;  %944 = vmatpush.msrb.mxu1 %v1408_v52  ;;  %v1400_v58 = vunpack.c.l.bf16 %v1522_v54 }
 0x1e3   :  { %851 = vmatpush.msra.mxu3 %v1341_v63 }
 0x1e4   :  { %832 = vmatpush.msra.mxu2 %v1308_v62  ;;  %945 = vmatpush.msrb.mxu1 %v1405_v53 }
 0x1e5   :  { %852 = vmatpush.msra.mxu3 %v1340_v1 }
 0x1e6   :  { %833 = vmatpush.msra.mxu2 %v1305_v60  ;;  %946 = vmatpush.msrb.mxu1 %v1404_v56  ;;  %v1521_v60 = vld [vmem:[#allocation2 + $0x340] sm:$0xff]  }
 0x1e7   :  { %853 = vmatpush.msra.mxu3 %v1337_v4  ;;  %v1397_v1 = vunpack.c.h.bf16 %v1521_v60  ;;  %v1396_v2 = vunpack.c.l.bf16 %v1521_v60 }
 0x1e8   :  { %834 = vmatpush.msra.mxu2 %v1304_v3  ;;  %947 = vmatpush.msrb.mxu1 %v1401_v57  ;;  %v893_v3 = vperm.slane %v1586_v55, 5 }
 0x1e9   :  { %854 = vmatpush.msra.mxu3 %v1336_v7 }
 0x1ea   :  { %835 = vmatpush.msra.mxu2 %v1301_v6  ;;  %948 = vmatpush.msrb.mxu1 %v1400_v58  ;;  %v930_v6 = vperm.slane %v1586_v55, 6 }
 0x1eb   :  { %855 = vmatpush.msra.mxu3 %v1333_v10 }
 0x1ec   :  { %836 = vmatpush.msra.mxu2 %v1300_v8  ;;  %949 = vmatpush.msrb.mxu1 %v1397_v1 }
 0x1ed   :  { %856 = vmatpush.msra.mxu3 %v1332_v11 }
 0x1ee   :  { %950 = vmatpush.msrb.mxu1 %v1396_v2 }
 0x247   :  { %v529_v17 = vpop.f32.mrf.mxu1 }
 0x24a   :  { %v509_v15 = vpop.f32.mrf.mxu0 }
 0x24b   :  { %v510_v16 = vadd.f32 %v509_v15, %v491_v14  ;;  %v1519_v14 = vld [vmem:[#allocation2 + $0x330] sm:$0xff]   ;;  %v1393_v15 = vunpack.c.h.bf16 %v1520_v13 }
 0x24d   :  { %v530_v18 = vadd.f32 %v529_v17, %v510_v16  ;;  %v1392_v16 = vunpack.c.l.bf16 %v1520_v13  ;;  %894 = vmatpush.msrb.mxu0 %v1393_v15  ;;  %v1389_v17 = vunpack.c.h.bf16 %v1519_v14 }
 0x24f   :  { %895 = vmatpush.msrb.mxu0 %v1392_v16 }
 0x250   :  { %v549_v19 = vpop.f32.mrf.mxu2 }
 0x251   :  { %v550_v20 = vadd.f32 %v549_v19, %v530_v18  ;;  %v1518_v18 = vld [vmem:[#allocation2 + $0x328] sm:$0xff]   ;;  %v1388_v19 = vunpack.c.l.bf16 %v1519_v14  ;;  %896 = vmatpush.msrb.mxu0 %v1389_v17 }
 0x253   :  { %v552_v21 = vmax.f32 %v550_v20, 0.0  ;;  %v1385_v20 = vunpack.c.h.bf16 %v1518_v18  ;;  %897 = vmatpush.msrb.mxu0 %v1388_v19 }
 0x255   :  { %v554_v22 = vrot.slane %v552_v21, 1  ;;  %898 = vmatpush.msrb.mxu0 %v1385_v20 }
 0x257   :  { %v556_v23 = vmax.f32 %v552_v21, %v554_v22  ;;  %v1517_v21 = vld [vmem:[#allocation2 + $0x320] sm:$0xff]   ;;  %v1384_v22 = vunpack.c.l.bf16 %v1518_v18 }
 0x258   :  { %v1380_v26 = vunpack.c.l.bf16 %v1517_v21 }
 0x259   :  { %v558_v24 = vrot.slane %v556_v23, 1  ;;  %v560_v25 = vrot.slane %v556_v23, 2  ;;  %v562_v27 = vrot.slane %v556_v23, 3  ;;  %899 = vmatpush.msrb.mxu0 %v1384_v22 }
 0x25b   :  { %v564_v28 = vsel %vm113_vm1, %v556_v23, %v558_v24  ;;  %v1381_v23 = vunpack.c.h.bf16 %v1517_v21  ;;  %v1516_v24 = vld [vmem:[#allocation2 + $0x318] sm:$0xff]  }
 0x25c   :  { %v565_v29 = vsel %vm361_vm7, %v564_v28, %v560_v25  ;;  %v686_v25 = vperm.slane %v1586_v55, 3 }
 0x25d   :  { %v566_v30 = vsel %vm363_vm8, %v565_v29, %v562_v27  ;;  %900 = vmatpush.msrb.mxu0 %v1381_v23  ;;  %v1377_v27 = vunpack.c.h.bf16 %v1516_v24  ;;  %v1515_v29 = vld [vmem:[#allocation2 + $0x310] sm:$0xff]  }
 0x25e   :  { %v667_v31 = vrot.slane %v566_v30, 1  ;;  %723 = vmatmul.f32.vlgmr.msra.gmra.mxu0 %v566_v30  ;;  %v664_v32 = vrot.slane %v566_v30, 7  ;;  %v1372_v37 = vunpack.c.l.bf16 %v1515_v29 }
 0x25f   :  { %901 = vmatpush.msrb.mxu0 %v1380_v26 }
 0x260   :  { %v666_v33 = vsel %vm113_vm1, 0.0, %v664_v32  ;;  %v669_v34 = vsel %vm363_vm8, %v667_v31, 0.0  ;;  %v1376_v31 = vunpack.c.l.bf16 %v1516_v24 }
 0x261   :  { %974 = vmatmul.msk.f32.vlgmr.msrb.gmra.mxu3 %vm1495_vm14, %v666_v33  ;;  %976 = vmatmul.msk.f32.vlgmr.msra.gmra.mxu1 %vm1496_vm15, %v669_v34  ;;  %v1373_v34 = vunpack.c.h.bf16 %v1515_v29 }
 0x262   :  { %902 = vmatpush.msrb.mxu0 %v1377_v27 }
 0x264   :  { %903 = vmatpush.msrb.mxu0 %v1376_v31 }
 0x266   :  { %904 = vmatpush.msrb.mxu0 %v1373_v34 }
 0x268   :  { %905 = vmatpush.msrb.mxu0 %v1372_v37 }
 0x269   :  { %857 = vmatmul.f32.vlgmr.msra.gmra.mxu3 %v28_v12 }
 0x26a   :  { %906 = vmatpush.msrb.mxu0 %v1369_v39 }
 0x26c   :  { %907 = vmatpush.msrb.mxu0 %v1368_v44 }
 0x26e   :  { %908 = vmatpush.msrb.mxu0 %v1365_v46 }
 0x270   :  { %909 = vmatpush.msrb.mxu0 %v1364_v48 }
 0x2db   :  { %v724_v32 = vpop.f32.mrf.mxu0 }
 0x2de   :  { %v744_v35 = vpop.f32.mrf.mxu1 }
 0x2e4   :  { %v704_v28 = vpop.f32.mrf.mxu3 }
 0x2e5   :  { %v705_v30 = vadd.f32 %v704_v28, %v686_v25 }
 0x2e7   :  { %v725_v33 = vadd.f32 %v724_v32, %v705_v30 }
 0x2e9   :  { %v745_v36 = vadd.f32 %v744_v35, %v725_v33 }
 0x2eb   :  { %v747_v38 = vmax.f32 %v745_v36, 0.0 }
 0x2ec   :  { %v858_v62 = vpop.f32.mrf.mxu3 }
 0x2ed   :  { %v749_v40 = vrot.slane %v747_v38, 1 }
 0x2ef   :  { %v751_v41 = vmax.f32 %v747_v38, %v749_v40 }
 0x2f1   :  { %v753_v42 = vrot.slane %v751_v41, 1 }
 0x2f3   :  { %v755_v43 = vsel %vm113_vm1, %v751_v41, %v753_v42 }
 0x2f4   :  { %837 = vmatmul.f32.vlgmr.msra.gmra.mxu2 %v755_v43 }
 0x377   :  { %v838_v61 = vpop.f32.mrf.mxu2 }
 0x378   :  { %v839_v63 = vadd.f32 %v838_v61, %v820_v59 }
 0x37a   :  { %v859_v0 = vadd.f32 %v858_v62, %v839_v63 }
 0x37c   :  { %910 = vmatmul.f32.vlgmr.msrb.gmra.mxu0 %v859_v0 }
 0x3f9   :  { %v911_v4 = vpop.f32.mrf.mxu0 }
 0x3fa   :  { %v912_v5 = vadd.f32 %v911_v4, %v893_v3 }
 0x3fc   :  { %977 = vmatmul.msk.f32.vlgmr.msrb.gmra.mxu1 %vm931_vm0, %v912_v5 }
 0x479   :  { %v952_v7 = vpop.f32.mrf.mxu1 }
 0x47a   :  { %v953_v8 = vadd.f32 %v952_v7, %v930_v6 }
 0x47c   :  { %955 = vst [vmem:[%s1644_s2] sm:$0x3] %v953_v8 }
 0x47d   :  { %960 = vsyncpa [#allocation3], 1 }

</bundles_post_ra>
